<compile_context>
chip_gen: v5e
topology: v5e:2x2
jax: 0.10.0
libtpu: 0.0.40
codegen_flags: <defaults>
</compile_context>

<pallas_src>
import jax
import jax.numpy as jnp
import numpy as np
from jax.experimental import pallas as pl
from jax.experimental.pallas import tpu as pltpu

# Architecture constants (fixed by the PyTorch module).
H0 = W0 = 28            # input spatial size
G1 = 16                 # padded grid for pool1 output / conv2 input (14x14 + 1 ring)
C1, C2 = 8, 16          # conv output channels
P2 = 7                  # pool2 output spatial size
NUM_CLASSES = 10


def _vmem():
    # Whole-array block resident in VMEM (all operands are tiny).
    return pl.BlockSpec(memory_space=pltpu.MemorySpace.VMEM)


# ---------------------------------------------------------------------------
# The single fused kernel
# ---------------------------------------------------------------------------

def _convnet_kernel(planes_ref, mask_ref, w1_ref, b1_ref, w2_ref, b2_ref,
                    g2_ref, w3_ref, b3_ref, logits_ref, probas_ref):
    planes = planes_ref[...]          # (4, N*256)   parity-split padded input
    mask = mask_ref[...]              # (1, N*256)   1.0 on 14x14 interior, 0 on ring
    w1 = w1_ref[...]                  # (8, 9)       cols ordered (dy, dx)
    b1 = b1_ref[...]                  # (8, 1)
    w2 = w2_ref[...]                  # (16, 72)     cols ordered (dy, dx, ci)
    b2 = b2_ref[...]                  # (16, 1)
    g2 = g2_ref[...]                  # (N*256, N*49)  0/1 pool2 down-sample selector
    w3 = w3_ref[...]                  # (16, 49, 10)   linear weight, (c, m, k)
    b3 = b3_ref[...]                  # (1, 10)

    m_flat = planes.shape[1]          # N * 256
    n_img = m_flat // (G1 * G1)

    def shift_flat(arr, off):
        # result[q] = arr[q + off] for static off; the circular wrap only
        # pollutes padding-ring / never-read positions.
        return arr if off == 0 else jnp.roll(arr, -off, axis=1)

    # ---- conv1 (3x3, pad 1) + ReLU fused with 2x2 max-pool -------------------
    # Each pool-window position (wy, wx) is one (8,9)@(9, N*256) matmul over the
    # parity planes; the 2x2 max-pool is a 4-way elementwise max of the results.
    pool1 = None
    for wy in range(2):
        for wx in range(2):
            taps = []
            for dy in range(3):
                for dx in range(3):
                    py, ay = (wy + dy) % 2, (wy + dy) // 2
                    px, ax = (wx + dx) % 2, (wx + dx) // 2
                    row = planes[py * 2 + px:py * 2 + px + 1, :]      # (1, N*256)
                    taps.append(shift_flat(row, (ay - 1) * G1 + (ax - 1)))
            patches = jnp.concatenate(taps, axis=0)                   # (9, N*256)
            out = jnp.dot(w1, patches,
                          preferred_element_type=jnp.float32)         # (8, N*256)
            pool1 = out if pool1 is None else jnp.maximum(pool1, out)
    # bias/ReLU commute with the window max; the mask zeroes the padding ring so
    # x2 is directly conv2's zero-padded 16x16-per-image input grid.
    x2 = jnp.maximum(pool1 + b1, 0.0) * mask                          # (8, N*256)

    # ---- conv2 (3x3, pad 1) + ReLU -------------------------------------------
    taps2 = []
    for dy in range(3):
        for dx in range(3):
            taps2.append(shift_flat(x2, (dy - 1) * G1 + (dx - 1)))     # (8, N*256)
    patches2 = jnp.concatenate(taps2, axis=0)                          # (72, N*256)
    c2 = jnp.dot(w2, patches2, preferred_element_type=jnp.float32) + b2
    c2 = jnp.maximum(c2, 0.0)                                          # (16, N*256)

    # ---- 2x2 max-pool: rolled maxes + 0/1 selection matmul (down-sample) ------
    hmax = jnp.maximum(c2, shift_flat(c2, 1))
    vmax = jnp.maximum(hmax, shift_flat(hmax, G1))   # 2x2 window max at its top-left
    pool2 = jnp.dot(vmax, g2, preferred_element_type=jnp.float32)      # (16, N*49)

    # ---- linear + softmax (PyTorch NCHW .view(-1, 16*7*7) order) --------------
    # Contract over (channel, 7x7) as 16 accumulated (N,49)@(49,10) matmuls so no
    # activation transpose / reshape is needed inside the kernel.
    imgs = [pool2[:, n * P2 * P2:(n + 1) * P2 * P2] for n in range(n_img)]  # (16, 49) each
    acc = None
    for c in range(C2):
        a_c = jnp.concatenate([img[c:c + 1, :] for img in imgs], axis=0)    # (N, 49)
        term = jnp.dot(a_c, w3[c], preferred_element_type=jnp.float32)      # (N, 10)
        acc = term if acc is None else acc + term
    logits = acc + b3                                                       # (N, 10)
    logits_ref[...] = logits

    mx = jnp.max(logits, axis=1, keepdims=True)
    e = jnp.exp(logits - mx)
    denom = jnp.sum(e, axis=1, keepdims=True)
    probas_ref[...] = e * pl.reciprocal(denom, approx=True)


# ---------------------------------------------------------------------------
# Wrapper: tiny layout prep (input pad + parity split, weight re-arrangement)
# ---------------------------------------------------------------------------

def _pool2_selector(n_img):
    """0/1 matrix mapping the flat 16x16 conv2 grid to the flat 7x7 pool2 output."""
    sel = np.zeros((n_img * G1 * G1, n_img * P2 * P2), np.float32)
    for n in range(n_img):
        for oy in range(P2):
            for ox in range(P2):
                q = n * G1 * G1 + (2 * oy + 1) * G1 + (2 * ox + 1)
                sel[q, n * P2 * P2 + oy * P2 + ox] = 1.0
    return jnp.asarray(sel)


def _interior_mask(n_img):
    m = np.zeros((G1, G1), np.float32)
    m[1:G1 - 1, 1:G1 - 1] = 1.0
    return jnp.asarray(np.tile(m.reshape(-1), n_img).reshape(1, -1))


def _parity_planes(x_nchw):
    """Pad to 30x30, split into the 4 even/odd (row, col) parity planes, each
    embedded into a flat 16x16-per-image grid (the pool1 / conv2 grid)."""
    n = x_nchw.shape[0]
    img = x_nchw[:, 0, :, :].astype(jnp.float32)                  # (N, 28, 28)
    xp = jnp.pad(img, ((0, 0), (1, 1), (1, 1)))                   # (N, 30, 30)
    sp = xp.reshape(n, 15, 2, 15, 2)                              # (n, u, py, v, px)
    sp = jnp.transpose(sp, (2, 4, 0, 1, 3))                       # (py, px, n, u, v)
    sp = jnp.pad(sp, ((0, 0), (0, 0), (0, 0), (0, 1), (0, 1)))    # 15x15 -> 16x16
    return sp.reshape(4, n * G1 * G1)                             # (4, N*256)


def convnet_forward(x_nchw, params):
    n_img = x_nchw.shape[0]

    planes = _parity_planes(x_nchw)
    mask = _interior_mask(n_img)
    g2 = _pool2_selector(n_img)

    w1 = params["conv1_w"].reshape(C1, 9)                                 # (8, 9)
    b1 = params["conv1_b"].reshape(C1, 1)
    w2 = jnp.transpose(params["conv2_w"], (0, 2, 3, 1)).reshape(C2, 72)   # (16, 72)
    b2 = params["conv2_b"].reshape(C2, 1)
    w3 = jnp.transpose(params["lin_w"]).reshape(C2, P2 * P2, NUM_CLASSES)  # (16, 49, 10)
    b3 = params["lin_b"].reshape(1, NUM_CLASSES)

    logits, probas = pl.pallas_call(
        _convnet_kernel,
        out_shape=(jax.ShapeDtypeStruct((n_img, NUM_CLASSES), jnp.float32),
                   jax.ShapeDtypeStruct((n_img, NUM_CLASSES), jnp.float32)),
        in_specs=[_vmem()] * 9,
        out_specs=(_vmem(), _vmem()),
    )(planes, mask, w1, b1, w2, b2, g2, w3, b3)
    return logits, probas


# ---------------------------------------------------------------------------
# Pure-JAX reference (mirrors the PyTorch module) and harness
# ---------------------------------------------------------------------------

def convnet_reference(x_nchw, params):
    dn = ("NCHW", "OIHW", "NCHW")
    prec = jax.lax.Precision.HIGHEST
    y = jax.lax.conv_general_dilated(x_nchw, params["conv1_w"], (1, 1),
                                     ((1, 1), (1, 1)), dimension_numbers=dn,
                                     precision=prec)
    y = jax.nn.relu(y + params["conv1_b"].reshape(1, -1, 1, 1))
    y = jax.lax.reduce_window(y, -jnp.inf, jax.lax.max,
                              (1, 1, 2, 2), (1, 1, 2, 2), "VALID")
    y = jax.lax.conv_general_dilated(y, params["conv2_w"], (1, 1),
                                     ((1, 1), (1, 1)), dimension_numbers=dn,
                                     precision=prec)
    y = jax.nn.relu(y + params["conv2_b"].reshape(1, -1, 1, 1))
    y = jax.lax.reduce_window(y, -jnp.inf, jax.lax.max,
                              (1, 1, 2, 2), (1, 1, 2, 2), "VALID")
    flat = y.reshape(y.shape[0], -1)
    logits = jnp.dot(flat, params["lin_w"].T, precision=prec) + params["lin_b"]
    probas = jax.nn.softmax(logits, axis=1)
    return logits, probas


def init_params(key, num_classes=NUM_CLASSES):
    ks = jax.random.split(key, 6)
    return {
        "conv1_w": 0.1 * jax.random.normal(ks[0], (C1, 1, 3, 3), jnp.float32),
        "conv1_b": 0.1 * jax.random.normal(ks[1], (C1,), jnp.float32),
        "conv2_w": 0.1 * jax.random.normal(ks[2], (C2, C1, 3, 3), jnp.float32),
        "conv2_b": 0.1 * jax.random.normal(ks[3], (C2,), jnp.float32),
        "lin_w": 0.05 * jax.random.normal(ks[4], (num_classes, C2 * P2 * P2), jnp.float32),
        "lin_b": 0.05 * jax.random.normal(ks[5], (num_classes,), jnp.float32),
    }


if __name__ == "__main__":
    key = jax.random.PRNGKey(0)
    k_params, k_x = jax.random.split(key)
    params = init_params(k_params)
    # MNIST-shaped input (the 16*7*7 flatten in the module requires 28x28).
    x = jax.random.normal(k_x, (2, 1, 28, 28), jnp.float32)

    fwd = jax.jit(convnet_forward)
    logits, probas = fwd(x, params)
    jax.block_until_ready((logits, probas))

    assert logits.shape == (2, NUM_CLASSES) and probas.shape == (2, NUM_CLASSES)
    # Softmax sanity (approx reciprocal on the denominator -> loose-ish tol).
    assert bool(jnp.allclose(jnp.sum(probas, axis=1), 1.0, atol=1e-2))

    # Cross-check the fused kernel against a pure-JAX reference of the module.
    ref_logits, ref_probas = jax.jit(convnet_reference)(x, params)
    assert bool(jnp.allclose(logits, ref_logits, atol=3e-2, rtol=1e-2))
    assert bool(jnp.allclose(probas, ref_probas, atol=1e-2))

    print("KERNEL_OK")
</pallas_src>

<mosaic_0001>
module attributes {stable_mosaic.version = 11 : i64} {
  func.func @_convnet_kernel(%arg0: memref<4x512xf32, #tpu.memory_space<vmem>>, %arg1: memref<1x512xf32, #tpu.memory_space<vmem>>, %arg2: memref<8x9xf32, #tpu.memory_space<vmem>>, %arg3: memref<8x1xf32, #tpu.memory_space<vmem>>, %arg4: memref<16x72xf32, #tpu.memory_space<vmem>>, %arg5: memref<16x1xf32, #tpu.memory_space<vmem>>, %arg6: memref<512x98xf32, #tpu.memory_space<vmem>>, %arg7: memref<16x49x10xf32, #tpu.memory_space<vmem>>, %arg8: memref<1x10xf32, #tpu.memory_space<vmem>>, %arg9: memref<2x10xf32, #tpu.memory_space<vmem>>, %arg10: memref<2x10xf32, #tpu.memory_space<vmem>>) attributes {dimension_semantics = [], scalar_prefetch = 0 : i64, scratch_operands = 0 : i64, tpu.core_type = #tpu.core_type<tc>} {
    %c0 = arith.constant 0 : index
    %c0_0 = arith.constant 0 : index
    %0 = vector.load %arg0[%c0, %c0_0] : memref<4x512xf32, #tpu.memory_space<vmem>>, vector<4x512xf32>
    %c0_1 = arith.constant 0 : index
    %c0_2 = arith.constant 0 : index
    %1 = vector.load %arg1[%c0_1, %c0_2] : memref<1x512xf32, #tpu.memory_space<vmem>>, vector<1x512xf32>
    %c0_3 = arith.constant 0 : index
    %c0_4 = arith.constant 0 : index
    %2 = vector.load %arg2[%c0_3, %c0_4] : memref<8x9xf32, #tpu.memory_space<vmem>>, vector<8x9xf32>
    %c0_5 = arith.constant 0 : index
    %c0_6 = arith.constant 0 : index
    %3 = vector.load %arg3[%c0_5, %c0_6] : memref<8x1xf32, #tpu.memory_space<vmem>>, vector<8x1xf32>
    %c0_7 = arith.constant 0 : index
    %c0_8 = arith.constant 0 : index
    %4 = vector.load %arg4[%c0_7, %c0_8] : memref<16x72xf32, #tpu.memory_space<vmem>>, vector<16x72xf32>
    %c0_9 = arith.constant 0 : index
    %c0_10 = arith.constant 0 : index
    %5 = vector.load %arg5[%c0_9, %c0_10] : memref<16x1xf32, #tpu.memory_space<vmem>>, vector<16x1xf32>
    %c0_11 = arith.constant 0 : index
    %c0_12 = arith.constant 0 : index
    %6 = vector.load %arg6[%c0_11, %c0_12] : memref<512x98xf32, #tpu.memory_space<vmem>>, vector<512x98xf32>
    %c0_13 = arith.constant 0 : index
    %c0_14 = arith.constant 0 : index
    %c0_15 = arith.constant 0 : index
    %7 = vector.load %arg7[%c0_13, %c0_14, %c0_15] : memref<16x49x10xf32, #tpu.memory_space<vmem>>, vector<16x49x10xf32>
    %c0_16 = arith.constant 0 : index
    %c0_17 = arith.constant 0 : index
    %8 = vector.load %arg8[%c0_16, %c0_17] : memref<1x10xf32, #tpu.memory_space<vmem>>, vector<1x10xf32>
    %9 = vector.extract_strided_slice %0 {offsets = [0, 0], sizes = [1, 512], strides = [1, 1]} : vector<4x512xf32> to vector<1x512xf32>
    %10 = vector.extract_strided_slice %9 {offsets = [0, 495], sizes = [1, 17], strides = [1, 1]} : vector<1x512xf32> to vector<1x17xf32>
    %11 = vector.extract_strided_slice %9 {offsets = [0, 0], sizes = [1, 495], strides = [1, 1]} : vector<1x512xf32> to vector<1x495xf32>
    %12 = tpu.concatenate %10, %11 in 1 : vector<1x17xf32>, vector<1x495xf32> -> vector<1x512xf32>
    %13 = vector.extract_strided_slice %0 {offsets = [1, 0], sizes = [1, 512], strides = [1, 1]} : vector<4x512xf32> to vector<1x512xf32>
    %14 = vector.extract_strided_slice %13 {offsets = [0, 495], sizes = [1, 17], strides = [1, 1]} : vector<1x512xf32> to vector<1x17xf32>
    %15 = vector.extract_strided_slice %13 {offsets = [0, 0], sizes = [1, 495], strides = [1, 1]} : vector<1x512xf32> to vector<1x495xf32>
    %16 = tpu.concatenate %14, %15 in 1 : vector<1x17xf32>, vector<1x495xf32> -> vector<1x512xf32>
    %17 = vector.extract_strided_slice %0 {offsets = [0, 0], sizes = [1, 512], strides = [1, 1]} : vector<4x512xf32> to vector<1x512xf32>
    %18 = vector.extract_strided_slice %17 {offsets = [0, 496], sizes = [1, 16], strides = [1, 1]} : vector<1x512xf32> to vector<1x16xf32>
    %19 = vector.extract_strided_slice %17 {offsets = [0, 0], sizes = [1, 496], strides = [1, 1]} : vector<1x512xf32> to vector<1x496xf32>
    %20 = tpu.concatenate %18, %19 in 1 : vector<1x16xf32>, vector<1x496xf32> -> vector<1x512xf32>
    %21 = vector.extract_strided_slice %0 {offsets = [2, 0], sizes = [1, 512], strides = [1, 1]} : vector<4x512xf32> to vector<1x512xf32>
    %22 = vector.extract_strided_slice %21 {offsets = [0, 495], sizes = [1, 17], strides = [1, 1]} : vector<1x512xf32> to vector<1x17xf32>
    %23 = vector.extract_strided_slice %21 {offsets = [0, 0], sizes = [1, 495], strides = [1, 1]} : vector<1x512xf32> to vector<1x495xf32>
    %24 = tpu.concatenate %22, %23 in 1 : vector<1x17xf32>, vector<1x495xf32> -> vector<1x512xf32>
    %25 = vector.extract_strided_slice %0 {offsets = [3, 0], sizes = [1, 512], strides = [1, 1]} : vector<4x512xf32> to vector<1x512xf32>
    %26 = vector.extract_strided_slice %25 {offsets = [0, 495], sizes = [1, 17], strides = [1, 1]} : vector<1x512xf32> to vector<1x17xf32>
    %27 = vector.extract_strided_slice %25 {offsets = [0, 0], sizes = [1, 495], strides = [1, 1]} : vector<1x512xf32> to vector<1x495xf32>
    %28 = tpu.concatenate %26, %27 in 1 : vector<1x17xf32>, vector<1x495xf32> -> vector<1x512xf32>
    %29 = vector.extract_strided_slice %0 {offsets = [2, 0], sizes = [1, 512], strides = [1, 1]} : vector<4x512xf32> to vector<1x512xf32>
    %30 = vector.extract_strided_slice %29 {offsets = [0, 496], sizes = [1, 16], strides = [1, 1]} : vector<1x512xf32> to vector<1x16xf32>
    %31 = vector.extract_strided_slice %29 {offsets = [0, 0], sizes = [1, 496], strides = [1, 1]} : vector<1x512xf32> to vector<1x496xf32>
    %32 = tpu.concatenate %30, %31 in 1 : vector<1x16xf32>, vector<1x496xf32> -> vector<1x512xf32>
    %33 = vector.extract_strided_slice %0 {offsets = [0, 0], sizes = [1, 512], strides = [1, 1]} : vector<4x512xf32> to vector<1x512xf32>
    %34 = vector.extract_strided_slice %33 {offsets = [0, 511], sizes = [1, 1], strides = [1, 1]} : vector<1x512xf32> to vector<1x1xf32>
    %35 = vector.extract_strided_slice %33 {offsets = [0, 0], sizes = [1, 511], strides = [1, 1]} : vector<1x512xf32> to vector<1x511xf32>
    %36 = tpu.concatenate %34, %35 in 1 : vector<1x1xf32>, vector<1x511xf32> -> vector<1x512xf32>
    %37 = vector.extract_strided_slice %0 {offsets = [1, 0], sizes = [1, 512], strides = [1, 1]} : vector<4x512xf32> to vector<1x512xf32>
    %38 = vector.extract_strided_slice %37 {offsets = [0, 511], sizes = [1, 1], strides = [1, 1]} : vector<1x512xf32> to vector<1x1xf32>
    %39 = vector.extract_strided_slice %37 {offsets = [0, 0], sizes = [1, 511], strides = [1, 1]} : vector<1x512xf32> to vector<1x511xf32>
    %40 = tpu.concatenate %38, %39 in 1 : vector<1x1xf32>, vector<1x511xf32> -> vector<1x512xf32>
    %41 = vector.extract_strided_slice %0 {offsets = [0, 0], sizes = [1, 512], strides = [1, 1]} : vector<4x512xf32> to vector<1x512xf32>
    %42 = tpu.concatenate %12, %16, %20, %24, %28, %32, %36, %40, %41 in 0 : vector<1x512xf32>, vector<1x512xf32>, vector<1x512xf32>, vector<1x512xf32>, vector<1x512xf32>, vector<1x512xf32>, vector<1x512xf32>, vector<1x512xf32>, vector<1x512xf32> -> vector<9x512xf32>
    %cst = arith.constant dense<0.000000e+00> : vector<8x512xf32>
    %43 = tpu.matmul %2, %42, %cst {dimension_numbers = #tpu.dot_dimension_numbers<[1], [0], [0], [1], [0, 0, 1, 1], [], []>} : vector<8x9xf32>, vector<9x512xf32>, vector<8x512xf32> -> vector<8x512xf32>
    %44 = vector.extract_strided_slice %0 {offsets = [1, 0], sizes = [1, 512], strides = [1, 1]} : vector<4x512xf32> to vector<1x512xf32>
    %45 = vector.extract_strided_slice %44 {offsets = [0, 495], sizes = [1, 17], strides = [1, 1]} : vector<1x512xf32> to vector<1x17xf32>
    %46 = vector.extract_strided_slice %44 {offsets = [0, 0], sizes = [1, 495], strides = [1, 1]} : vector<1x512xf32> to vector<1x495xf32>
    %47 = tpu.concatenate %45, %46 in 1 : vector<1x17xf32>, vector<1x495xf32> -> vector<1x512xf32>
    %48 = vector.extract_strided_slice %0 {offsets = [0, 0], sizes = [1, 512], strides = [1, 1]} : vector<4x512xf32> to vector<1x512xf32>
    %49 = vector.extract_strided_slice %48 {offsets = [0, 496], sizes = [1, 16], strides = [1, 1]} : vector<1x512xf32> to vector<1x16xf32>
    %50 = vector.extract_strided_slice %48 {offsets = [0, 0], sizes = [1, 496], strides = [1, 1]} : vector<1x512xf32> to vector<1x496xf32>
    %51 = tpu.concatenate %49, %50 in 1 : vector<1x16xf32>, vector<1x496xf32> -> vector<1x512xf32>
    %52 = vector.extract_strided_slice %0 {offsets = [1, 0], sizes = [1, 512], strides = [1, 1]} : vector<4x512xf32> to vector<1x512xf32>
    %53 = vector.extract_strided_slice %52 {offsets = [0, 496], sizes = [1, 16], strides = [1, 1]} : vector<1x512xf32> to vector<1x16xf32>
    %54 = vector.extract_strided_slice %52 {offsets = [0, 0], sizes = [1, 496], strides = [1, 1]} : vector<1x512xf32> to vector<1x496xf32>
    %55 = tpu.concatenate %53, %54 in 1 : vector<1x16xf32>, vector<1x496xf32> -> vector<1x512xf32>
    %56 = vector.extract_strided_slice %0 {offsets = [3, 0], sizes = [1, 512], strides = [1, 1]} : vector<4x512xf32> to vector<1x512xf32>
    %57 = vector.extract_strided_slice %56 {offsets = [0, 495], sizes = [1, 17], strides = [1, 1]} : vector<1x512xf32> to vector<1x17xf32>
    %58 = vector.extract_strided_slice %56 {offsets = [0, 0], sizes = [1, 495], strides = [1, 1]} : vector<1x512xf32> to vector<1x495xf32>
    %59 = tpu.concatenate %57, %58 in 1 : vector<1x17xf32>, vector<1x495xf32> -> vector<1x512xf32>
    %60 = vector.extract_strided_slice %0 {offsets = [2, 0], sizes = [1, 512], strides = [1, 1]} : vector<4x512xf32> to vector<1x512xf32>
    %61 = vector.extract_strided_slice %60 {offsets = [0, 496], sizes = [1, 16], strides = [1, 1]} : vector<1x512xf32> to vector<1x16xf32>
    %62 = vector.extract_strided_slice %60 {offsets = [0, 0], sizes = [1, 496], strides = [1, 1]} : vector<1x512xf32> to vector<1x496xf32>
    %63 = tpu.concatenate %61, %62 in 1 : vector<1x16xf32>, vector<1x496xf32> -> vector<1x512xf32>
    %64 = vector.extract_strided_slice %0 {offsets = [3, 0], sizes = [1, 512], strides = [1, 1]} : vector<4x512xf32> to vector<1x512xf32>
    %65 = vector.extract_strided_slice %64 {offsets = [0, 496], sizes = [1, 16], strides = [1, 1]} : vector<1x512xf32> to vector<1x16xf32>
    %66 = vector.extract_strided_slice %64 {offsets = [0, 0], sizes = [1, 496], strides = [1, 1]} : vector<1x512xf32> to vector<1x496xf32>
    %67 = tpu.concatenate %65, %66 in 1 : vector<1x16xf32>, vector<1x496xf32> -> vector<1x512xf32>
    %68 = vector.extract_strided_slice %0 {offsets = [1, 0], sizes = [1, 512], strides = [1, 1]} : vector<4x512xf32> to vector<1x512xf32>
    %69 = vector.extract_strided_slice %68 {offsets = [0, 511], sizes = [1, 1], strides = [1, 1]} : vector<1x512xf32> to vector<1x1xf32>
    %70 = vector.extract_strided_slice %68 {offsets = [0, 0], sizes = [1, 511], strides = [1, 1]} : vector<1x512xf32> to vector<1x511xf32>
    %71 = tpu.concatenate %69, %70 in 1 : vector<1x1xf32>, vector<1x511xf32> -> vector<1x512xf32>
    %72 = vector.extract_strided_slice %0 {offsets = [0, 0], sizes = [1, 512], strides = [1, 1]} : vector<4x512xf32> to vector<1x512xf32>
    %73 = vector.extract_strided_slice %0 {offsets = [1, 0], sizes = [1, 512], strides = [1, 1]} : vector<4x512xf32> to vector<1x512xf32>
    %74 = tpu.concatenate %47, %51, %55, %59, %63, %67, %71, %72, %73 in 0 : vector<1x512xf32>, vector<1x512xf32>, vector<1x512xf32>, vector<1x512xf32>, vector<1x512xf32>, vector<1x512xf32>, vector<1x512xf32>, vector<1x512xf32>, vector<1x512xf32> -> vector<9x512xf32>
    %cst_18 = arith.constant dense<0.000000e+00> : vector<8x512xf32>
    %75 = tpu.matmul %2, %74, %cst_18 {dimension_numbers = #tpu.dot_dimension_numbers<[1], [0], [0], [1], [0, 0, 1, 1], [], []>} : vector<8x9xf32>, vector<9x512xf32>, vector<8x512xf32> -> vector<8x512xf32>
    %76 = arith.maximumf %43, %75 : vector<8x512xf32>
    %77 = vector.extract_strided_slice %0 {offsets = [2, 0], sizes = [1, 512], strides = [1, 1]} : vector<4x512xf32> to vector<1x512xf32>
    %78 = vector.extract_strided_slice %77 {offsets = [0, 495], sizes = [1, 17], strides = [1, 1]} : vector<1x512xf32> to vector<1x17xf32>
    %79 = vector.extract_strided_slice %77 {offsets = [0, 0], sizes = [1, 495], strides = [1, 1]} : vector<1x512xf32> to vector<1x495xf32>
    %80 = tpu.concatenate %78, %79 in 1 : vector<1x17xf32>, vector<1x495xf32> -> vector<1x512xf32>
    %81 = vector.extract_strided_slice %0 {offsets = [3, 0], sizes = [1, 512], strides = [1, 1]} : vector<4x512xf32> to vector<1x512xf32>
    %82 = vector.extract_strided_slice %81 {offsets = [0, 495], sizes = [1, 17], strides = [1, 1]} : vector<1x512xf32> to vector<1x17xf32>
    %83 = vector.extract_strided_slice %81 {offsets = [0, 0], sizes = [1, 495], strides = [1, 1]} : vector<1x512xf32> to vector<1x495xf32>
    %84 = tpu.concatenate %82, %83 in 1 : vector<1x17xf32>, vector<1x495xf32> -> vector<1x512xf32>
    %85 = vector.extract_strided_slice %0 {offsets = [2, 0], sizes = [1, 512], strides = [1, 1]} : vector<4x512xf32> to vector<1x512xf32>
    %86 = vector.extract_strided_slice %85 {offsets = [0, 496], sizes = [1, 16], strides = [1, 1]} : vector<1x512xf32> to vector<1x16xf32>
    %87 = vector.extract_strided_slice %85 {offsets = [0, 0], sizes = [1, 496], strides = [1, 1]} : vector<1x512xf32> to vector<1x496xf32>
    %88 = tpu.concatenate %86, %87 in 1 : vector<1x16xf32>, vector<1x496xf32> -> vector<1x512xf32>
    %89 = vector.extract_strided_slice %0 {offsets = [0, 0], sizes = [1, 512], strides = [1, 1]} : vector<4x512xf32> to vector<1x512xf32>
    %90 = vector.extract_strided_slice %89 {offsets = [0, 511], sizes = [1, 1], strides = [1, 1]} : vector<1x512xf32> to vector<1x1xf32>
    %91 = vector.extract_strided_slice %89 {offsets = [0, 0], sizes = [1, 511], strides = [1, 1]} : vector<1x512xf32> to vector<1x511xf32>
    %92 = tpu.concatenate %90, %91 in 1 : vector<1x1xf32>, vector<1x511xf32> -> vector<1x512xf32>
    %93 = vector.extract_strided_slice %0 {offsets = [1, 0], sizes = [1, 512], strides = [1, 1]} : vector<4x512xf32> to vector<1x512xf32>
    %94 = vector.extract_strided_slice %93 {offsets = [0, 511], sizes = [1, 1], strides = [1, 1]} : vector<1x512xf32> to vector<1x1xf32>
    %95 = vector.extract_strided_slice %93 {offsets = [0, 0], sizes = [1, 511], strides = [1, 1]} : vector<1x512xf32> to vector<1x511xf32>
    %96 = tpu.concatenate %94, %95 in 1 : vector<1x1xf32>, vector<1x511xf32> -> vector<1x512xf32>
    %97 = vector.extract_strided_slice %0 {offsets = [0, 0], sizes = [1, 512], strides = [1, 1]} : vector<4x512xf32> to vector<1x512xf32>
    %98 = vector.extract_strided_slice %0 {offsets = [2, 0], sizes = [1, 512], strides = [1, 1]} : vector<4x512xf32> to vector<1x512xf32>
    %99 = vector.extract_strided_slice %98 {offsets = [0, 511], sizes = [1, 1], strides = [1, 1]} : vector<1x512xf32> to vector<1x1xf32>
    %100 = vector.extract_strided_slice %98 {offsets = [0, 0], sizes = [1, 511], strides = [1, 1]} : vector<1x512xf32> to vector<1x511xf32>
    %101 = tpu.concatenate %99, %100 in 1 : vector<1x1xf32>, vector<1x511xf32> -> vector<1x512xf32>
    %102 = vector.extract_strided_slice %0 {offsets = [3, 0], sizes = [1, 512], strides = [1, 1]} : vector<4x512xf32> to vector<1x512xf32>
    %103 = vector.extract_strided_slice %102 {offsets = [0, 511], sizes = [1, 1], strides = [1, 1]} : vector<1x512xf32> to vector<1x1xf32>
    %104 = vector.extract_strided_slice %102 {offsets = [0, 0], sizes = [1, 511], strides = [1, 1]} : vector<1x512xf32> to vector<1x511xf32>
    %105 = tpu.concatenate %103, %104 in 1 : vector<1x1xf32>, vector<1x511xf32> -> vector<1x512xf32>
    %106 = vector.extract_strided_slice %0 {offsets = [2, 0], sizes = [1, 512], strides = [1, 1]} : vector<4x512xf32> to vector<1x512xf32>
    %107 = tpu.concatenate %80, %84, %88, %92, %96, %97, %101, %105, %106 in 0 : vector<1x512xf32>, vector<1x512xf32>, vector<1x512xf32>, vector<1x512xf32>, vector<1x512xf32>, vector<1x512xf32>, vector<1x512xf32>, vector<1x512xf32>, vector<1x512xf32> -> vector<9x512xf32>
    %cst_19 = arith.constant dense<0.000000e+00> : vector<8x512xf32>
    %108 = tpu.matmul %2, %107, %cst_19 {dimension_numbers = #tpu.dot_dimension_numbers<[1], [0], [0], [1], [0, 0, 1, 1], [], []>} : vector<8x9xf32>, vector<9x512xf32>, vector<8x512xf32> -> vector<8x512xf32>
    %109 = arith.maximumf %76, %108 : vector<8x512xf32>
    %110 = vector.extract_strided_slice %0 {offsets = [3, 0], sizes = [1, 512], strides = [1, 1]} : vector<4x512xf32> to vector<1x512xf32>
    %111 = vector.extract_strided_slice %110 {offsets = [0, 495], sizes = [1, 17], strides = [1, 1]} : vector<1x512xf32> to vector<1x17xf32>
    %112 = vector.extract_strided_slice %110 {offsets = [0, 0], sizes = [1, 495], strides = [1, 1]} : vector<1x512xf32> to vector<1x495xf32>
    %113 = tpu.concatenate %111, %112 in 1 : vector<1x17xf32>, vector<1x495xf32> -> vector<1x512xf32>
    %114 = vector.extract_strided_slice %0 {offsets = [2, 0], sizes = [1, 512], strides = [1, 1]} : vector<4x512xf32> to vector<1x512xf32>
    %115 = vector.extract_strided_slice %114 {offsets = [0, 496], sizes = [1, 16], strides = [1, 1]} : vector<1x512xf32> to vector<1x16xf32>
    %116 = vector.extract_strided_slice %114 {offsets = [0, 0], sizes = [1, 496], strides = [1, 1]} : vector<1x512xf32> to vector<1x496xf32>
    %117 = tpu.concatenate %115, %116 in 1 : vector<1x16xf32>, vector<1x496xf32> -> vector<1x512xf32>
    %118 = vector.extract_strided_slice %0 {offsets = [3, 0], sizes = [1, 512], strides = [1, 1]} : vector<4x512xf32> to vector<1x512xf32>
    %119 = vector.extract_strided_slice %118 {offsets = [0, 496], sizes = [1, 16], strides = [1, 1]} : vector<1x512xf32> to vector<1x16xf32>
    %120 = vector.extract_strided_slice %118 {offsets = [0, 0], sizes = [1, 496], strides = [1, 1]} : vector<1x512xf32> to vector<1x496xf32>
    %121 = tpu.concatenate %119, %120 in 1 : vector<1x16xf32>, vector<1x496xf32> -> vector<1x512xf32>
    %122 = vector.extract_strided_slice %0 {offsets = [1, 0], sizes = [1, 512], strides = [1, 1]} : vector<4x512xf32> to vector<1x512xf32>
    %123 = vector.extract_strided_slice %122 {offsets = [0, 511], sizes = [1, 1], strides = [1, 1]} : vector<1x512xf32> to vector<1x1xf32>
    %124 = vector.extract_strided_slice %122 {offsets = [0, 0], sizes = [1, 511], strides = [1, 1]} : vector<1x512xf32> to vector<1x511xf32>
    %125 = tpu.concatenate %123, %124 in 1 : vector<1x1xf32>, vector<1x511xf32> -> vector<1x512xf32>
    %126 = vector.extract_strided_slice %0 {offsets = [0, 0], sizes = [1, 512], strides = [1, 1]} : vector<4x512xf32> to vector<1x512xf32>
    %127 = vector.extract_strided_slice %0 {offsets = [1, 0], sizes = [1, 512], strides = [1, 1]} : vector<4x512xf32> to vector<1x512xf32>
    %128 = vector.extract_strided_slice %0 {offsets = [3, 0], sizes = [1, 512], strides = [1, 1]} : vector<4x512xf32> to vector<1x512xf32>
    %129 = vector.extract_strided_slice %128 {offsets = [0, 511], sizes = [1, 1], strides = [1, 1]} : vector<1x512xf32> to vector<1x1xf32>
    %130 = vector.extract_strided_slice %128 {offsets = [0, 0], sizes = [1, 511], strides = [1, 1]} : vector<1x512xf32> to vector<1x511xf32>
    %131 = tpu.concatenate %129, %130 in 1 : vector<1x1xf32>, vector<1x511xf32> -> vector<1x512xf32>
    %132 = vector.extract_strided_slice %0 {offsets = [2, 0], sizes = [1, 512], strides = [1, 1]} : vector<4x512xf32> to vector<1x512xf32>
    %133 = vector.extract_strided_slice %0 {offsets = [3, 0], sizes = [1, 512], strides = [1, 1]} : vector<4x512xf32> to vector<1x512xf32>
    %134 = tpu.concatenate %113, %117, %121, %125, %126, %127, %131, %132, %133 in 0 : vector<1x512xf32>, vector<1x512xf32>, vector<1x512xf32>, vector<1x512xf32>, vector<1x512xf32>, vector<1x512xf32>, vector<1x512xf32>, vector<1x512xf32>, vector<1x512xf32> -> vector<9x512xf32>
    %cst_20 = arith.constant dense<0.000000e+00> : vector<8x512xf32>
    %135 = tpu.matmul %2, %134, %cst_20 {dimension_numbers = #tpu.dot_dimension_numbers<[1], [0], [0], [1], [0, 0, 1, 1], [], []>} : vector<8x9xf32>, vector<9x512xf32>, vector<8x512xf32> -> vector<8x512xf32>
    %136 = arith.maximumf %109, %135 : vector<8x512xf32>
    %137 = vector.broadcast %3 : vector<8x1xf32> to vector<8x512xf32>
    %138 = arith.addf %136, %137 : vector<8x512xf32>
    %cst_21 = arith.constant 0.000000e+00 : f32
    %139 = vector.broadcast %cst_21 : f32 to vector<8x512xf32>
    %140 = arith.maximumf %138, %139 : vector<8x512xf32>
    %141 = vector.broadcast %1 : vector<1x512xf32> to vector<8x512xf32>
    %142 = arith.mulf %140, %141 : vector<8x512xf32>
    %143 = vector.extract_strided_slice %142 {offsets = [0, 495], sizes = [8, 17], strides = [1, 1]} : vector<8x512xf32> to vector<8x17xf32>
    %144 = vector.extract_strided_slice %142 {offsets = [0, 0], sizes = [8, 495], strides = [1, 1]} : vector<8x512xf32> to vector<8x495xf32>
    %145 = tpu.concatenate %143, %144 in 1 : vector<8x17xf32>, vector<8x495xf32> -> vector<8x512xf32>
    %146 = vector.extract_strided_slice %142 {offsets = [0, 496], sizes = [8, 16], strides = [1, 1]} : vector<8x512xf32> to vector<8x16xf32>
    %147 = vector.extract_strided_slice %142 {offsets = [0, 0], sizes = [8, 496], strides = [1, 1]} : vector<8x512xf32> to vector<8x496xf32>
    %148 = tpu.concatenate %146, %147 in 1 : vector<8x16xf32>, vector<8x496xf32> -> vector<8x512xf32>
    %149 = vector.extract_strided_slice %142 {offsets = [0, 497], sizes = [8, 15], strides = [1, 1]} : vector<8x512xf32> to vector<8x15xf32>
    %150 = vector.extract_strided_slice %142 {offsets = [0, 0], sizes = [8, 497], strides = [1, 1]} : vector<8x512xf32> to vector<8x497xf32>
    %151 = tpu.concatenate %149, %150 in 1 : vector<8x15xf32>, vector<8x497xf32> -> vector<8x512xf32>
    %152 = vector.extract_strided_slice %142 {offsets = [0, 511], sizes = [8, 1], strides = [1, 1]} : vector<8x512xf32> to vector<8x1xf32>
    %153 = vector.extract_strided_slice %142 {offsets = [0, 0], sizes = [8, 511], strides = [1, 1]} : vector<8x512xf32> to vector<8x511xf32>
    %154 = tpu.concatenate %152, %153 in 1 : vector<8x1xf32>, vector<8x511xf32> -> vector<8x512xf32>
    %155 = vector.extract_strided_slice %142 {offsets = [0, 1], sizes = [8, 511], strides = [1, 1]} : vector<8x512xf32> to vector<8x511xf32>
    %156 = vector.extract_strided_slice %142 {offsets = [0, 0], sizes = [8, 1], strides = [1, 1]} : vector<8x512xf32> to vector<8x1xf32>
    %157 = tpu.concatenate %155, %156 in 1 : vector<8x511xf32>, vector<8x1xf32> -> vector<8x512xf32>
    %158 = vector.extract_strided_slice %142 {offsets = [0, 15], sizes = [8, 497], strides = [1, 1]} : vector<8x512xf32> to vector<8x497xf32>
    %159 = vector.extract_strided_slice %142 {offsets = [0, 0], sizes = [8, 15], strides = [1, 1]} : vector<8x512xf32> to vector<8x15xf32>
    %160 = tpu.concatenate %158, %159 in 1 : vector<8x497xf32>, vector<8x15xf32> -> vector<8x512xf32>
    %161 = vector.extract_strided_slice %142 {offsets = [0, 16], sizes = [8, 496], strides = [1, 1]} : vector<8x512xf32> to vector<8x496xf32>
    %162 = vector.extract_strided_slice %142 {offsets = [0, 0], sizes = [8, 16], strides = [1, 1]} : vector<8x512xf32> to vector<8x16xf32>
    %163 = tpu.concatenate %161, %162 in 1 : vector<8x496xf32>, vector<8x16xf32> -> vector<8x512xf32>
    %164 = vector.extract_strided_slice %142 {offsets = [0, 17], sizes = [8, 495], strides = [1, 1]} : vector<8x512xf32> to vector<8x495xf32>
    %165 = vector.extract_strided_slice %142 {offsets = [0, 0], sizes = [8, 17], strides = [1, 1]} : vector<8x512xf32> to vector<8x17xf32>
    %166 = tpu.concatenate %164, %165 in 1 : vector<8x495xf32>, vector<8x17xf32> -> vector<8x512xf32>
    %167 = tpu.concatenate %145, %148, %151, %154, %142, %157, %160, %163, %166 in 0 : vector<8x512xf32>, vector<8x512xf32>, vector<8x512xf32>, vector<8x512xf32>, vector<8x512xf32>, vector<8x512xf32>, vector<8x512xf32>, vector<8x512xf32>, vector<8x512xf32> -> vector<72x512xf32>
    %cst_22 = arith.constant dense<0.000000e+00> : vector<16x512xf32>
    %168 = tpu.matmul %4, %167, %cst_22 {dimension_numbers = #tpu.dot_dimension_numbers<[1], [0], [0], [1], [0, 0, 1, 1], [], []>} : vector<16x72xf32>, vector<72x512xf32>, vector<16x512xf32> -> vector<16x512xf32>
    %169 = vector.broadcast %5 : vector<16x1xf32> to vector<16x512xf32>
    %170 = arith.addf %168, %169 : vector<16x512xf32>
    %cst_23 = arith.constant 0.000000e+00 : f32
    %171 = vector.broadcast %cst_23 : f32 to vector<16x512xf32>
    %172 = arith.maximumf %170, %171 : vector<16x512xf32>
    %173 = vector.extract_strided_slice %172 {offsets = [0, 1], sizes = [16, 511], strides = [1, 1]} : vector<16x512xf32> to vector<16x511xf32>
    %174 = vector.extract_strided_slice %172 {offsets = [0, 0], sizes = [16, 1], strides = [1, 1]} : vector<16x512xf32> to vector<16x1xf32>
    %175 = tpu.concatenate %173, %174 in 1 : vector<16x511xf32>, vector<16x1xf32> -> vector<16x512xf32>
    %176 = arith.maximumf %172, %175 : vector<16x512xf32>
    %177 = vector.extract_strided_slice %176 {offsets = [0, 16], sizes = [16, 496], strides = [1, 1]} : vector<16x512xf32> to vector<16x496xf32>
    %178 = vector.extract_strided_slice %176 {offsets = [0, 0], sizes = [16, 16], strides = [1, 1]} : vector<16x512xf32> to vector<16x16xf32>
    %179 = tpu.concatenate %177, %178 in 1 : vector<16x496xf32>, vector<16x16xf32> -> vector<16x512xf32>
    %180 = arith.maximumf %176, %179 : vector<16x512xf32>
    %cst_24 = arith.constant dense<0.000000e+00> : vector<16x98xf32>
    %181 = tpu.matmul %180, %6, %cst_24 {dimension_numbers = #tpu.dot_dimension_numbers<[1], [0], [0], [1], [0, 0, 1, 1], [], []>} : vector<16x512xf32>, vector<512x98xf32>, vector<16x98xf32> -> vector<16x98xf32>
    %182 = vector.extract_strided_slice %181 {offsets = [0, 0], sizes = [16, 49], strides = [1, 1]} : vector<16x98xf32> to vector<16x49xf32>
    %183 = vector.extract_strided_slice %181 {offsets = [0, 49], sizes = [16, 49], strides = [1, 1]} : vector<16x98xf32> to vector<16x49xf32>
    %184 = vector.extract_strided_slice %182 {offsets = [0, 0], sizes = [1, 49], strides = [1, 1]} : vector<16x49xf32> to vector<1x49xf32>
    %185 = vector.extract_strided_slice %183 {offsets = [0, 0], sizes = [1, 49], strides = [1, 1]} : vector<16x49xf32> to vector<1x49xf32>
    %186 = tpu.concatenate %184, %185 in 0 : vector<1x49xf32>, vector<1x49xf32> -> vector<2x49xf32>
    %187 = vector.extract_strided_slice %7 {offsets = [0, 0, 0], sizes = [1, 49, 10], strides = [1, 1, 1]} : vector<16x49x10xf32> to vector<1x49x10xf32>
    %188 = vector.shape_cast %187 : vector<1x49x10xf32> to vector<49x10xf32>
    %cst_25 = arith.constant dense<0.000000e+00> : vector<2x10xf32>
    %189 = tpu.matmul %186, %188, %cst_25 {dimension_numbers = #tpu.dot_dimension_numbers<[1], [0], [0], [1], [0, 0, 1, 1], [], []>} : vector<2x49xf32>, vector<49x10xf32>, vector<2x10xf32> -> vector<2x10xf32>
    %190 = vector.extract_strided_slice %182 {offsets = [1, 0], sizes = [1, 49], strides = [1, 1]} : vector<16x49xf32> to vector<1x49xf32>
    %191 = vector.extract_strided_slice %183 {offsets = [1, 0], sizes = [1, 49], strides = [1, 1]} : vector<16x49xf32> to vector<1x49xf32>
    %192 = tpu.concatenate %190, %191 in 0 : vector<1x49xf32>, vector<1x49xf32> -> vector<2x49xf32>
    %193 = vector.extract_strided_slice %7 {offsets = [1, 0, 0], sizes = [1, 49, 10], strides = [1, 1, 1]} : vector<16x49x10xf32> to vector<1x49x10xf32>
    %194 = vector.shape_cast %193 : vector<1x49x10xf32> to vector<49x10xf32>
    %cst_26 = arith.constant dense<0.000000e+00> : vector<2x10xf32>
    %195 = tpu.matmul %192, %194, %cst_26 {dimension_numbers = #tpu.dot_dimension_numbers<[1], [0], [0], [1], [0, 0, 1, 1], [], []>} : vector<2x49xf32>, vector<49x10xf32>, vector<2x10xf32> -> vector<2x10xf32>
    %196 = arith.addf %189, %195 : vector<2x10xf32>
    %197 = vector.extract_strided_slice %182 {offsets = [2, 0], sizes = [1, 49], strides = [1, 1]} : vector<16x49xf32> to vector<1x49xf32>
    %198 = vector.extract_strided_slice %183 {offsets = [2, 0], sizes = [1, 49], strides = [1, 1]} : vector<16x49xf32> to vector<1x49xf32>
    %199 = tpu.concatenate %197, %198 in 0 : vector<1x49xf32>, vector<1x49xf32> -> vector<2x49xf32>
    %200 = vector.extract_strided_slice %7 {offsets = [2, 0, 0], sizes = [1, 49, 10], strides = [1, 1, 1]} : vector<16x49x10xf32> to vector<1x49x10xf32>
    %201 = vector.shape_cast %200 : vector<1x49x10xf32> to vector<49x10xf32>
    %cst_27 = arith.constant dense<0.000000e+00> : vector<2x10xf32>
    %202 = tpu.matmul %199, %201, %cst_27 {dimension_numbers = #tpu.dot_dimension_numbers<[1], [0], [0], [1], [0, 0, 1, 1], [], []>} : vector<2x49xf32>, vector<49x10xf32>, vector<2x10xf32> -> vector<2x10xf32>
    %203 = arith.addf %196, %202 : vector<2x10xf32>
    %204 = vector.extract_strided_slice %182 {offsets = [3, 0], sizes = [1, 49], strides = [1, 1]} : vector<16x49xf32> to vector<1x49xf32>
    %205 = vector.extract_strided_slice %183 {offsets = [3, 0], sizes = [1, 49], strides = [1, 1]} : vector<16x49xf32> to vector<1x49xf32>
    %206 = tpu.concatenate %204, %205 in 0 : vector<1x49xf32>, vector<1x49xf32> -> vector<2x49xf32>
    %207 = vector.extract_strided_slice %7 {offsets = [3, 0, 0], sizes = [1, 49, 10], strides = [1, 1, 1]} : vector<16x49x10xf32> to vector<1x49x10xf32>
    %208 = vector.shape_cast %207 : vector<1x49x10xf32> to vector<49x10xf32>
    %cst_28 = arith.constant dense<0.000000e+00> : vector<2x10xf32>
    %209 = tpu.matmul %206, %208, %cst_28 {dimension_numbers = #tpu.dot_dimension_numbers<[1], [0], [0], [1], [0, 0, 1, 1], [], []>} : vector<2x49xf32>, vector<49x10xf32>, vector<2x10xf32> -> vector<2x10xf32>
    %210 = arith.addf %203, %209 : vector<2x10xf32>
    %211 = vector.extract_strided_slice %182 {offsets = [4, 0], sizes = [1, 49], strides = [1, 1]} : vector<16x49xf32> to vector<1x49xf32>
    %212 = vector.extract_strided_slice %183 {offsets = [4, 0], sizes = [1, 49], strides = [1, 1]} : vector<16x49xf32> to vector<1x49xf32>
    %213 = tpu.concatenate %211, %212 in 0 : vector<1x49xf32>, vector<1x49xf32> -> vector<2x49xf32>
    %214 = vector.extract_strided_slice %7 {offsets = [4, 0, 0], sizes = [1, 49, 10], strides = [1, 1, 1]} : vector<16x49x10xf32> to vector<1x49x10xf32>
    %215 = vector.shape_cast %214 : vector<1x49x10xf32> to vector<49x10xf32>
    %cst_29 = arith.constant dense<0.000000e+00> : vector<2x10xf32>
    %216 = tpu.matmul %213, %215, %cst_29 {dimension_numbers = #tpu.dot_dimension_numbers<[1], [0], [0], [1], [0, 0, 1, 1], [], []>} : vector<2x49xf32>, vector<49x10xf32>, vector<2x10xf32> -> vector<2x10xf32>
    %217 = arith.addf %210, %216 : vector<2x10xf32>
    %218 = vector.extract_strided_slice %182 {offsets = [5, 0], sizes = [1, 49], strides = [1, 1]} : vector<16x49xf32> to vector<1x49xf32>
    %219 = vector.extract_strided_slice %183 {offsets = [5, 0], sizes = [1, 49], strides = [1, 1]} : vector<16x49xf32> to vector<1x49xf32>
    %220 = tpu.concatenate %218, %219 in 0 : vector<1x49xf32>, vector<1x49xf32> -> vector<2x49xf32>
    %221 = vector.extract_strided_slice %7 {offsets = [5, 0, 0], sizes = [1, 49, 10], strides = [1, 1, 1]} : vector<16x49x10xf32> to vector<1x49x10xf32>
    %222 = vector.shape_cast %221 : vector<1x49x10xf32> to vector<49x10xf32>
    %cst_30 = arith.constant dense<0.000000e+00> : vector<2x10xf32>
    %223 = tpu.matmul %220, %222, %cst_30 {dimension_numbers = #tpu.dot_dimension_numbers<[1], [0], [0], [1], [0, 0, 1, 1], [], []>} : vector<2x49xf32>, vector<49x10xf32>, vector<2x10xf32> -> vector<2x10xf32>
    %224 = arith.addf %217, %223 : vector<2x10xf32>
    %225 = vector.extract_strided_slice %182 {offsets = [6, 0], sizes = [1, 49], strides = [1, 1]} : vector<16x49xf32> to vector<1x49xf32>
    %226 = vector.extract_strided_slice %183 {offsets = [6, 0], sizes = [1, 49], strides = [1, 1]} : vector<16x49xf32> to vector<1x49xf32>
    %227 = tpu.concatenate %225, %226 in 0 : vector<1x49xf32>, vector<1x49xf32> -> vector<2x49xf32>
    %228 = vector.extract_strided_slice %7 {offsets = [6, 0, 0], sizes = [1, 49, 10], strides = [1, 1, 1]} : vector<16x49x10xf32> to vector<1x49x10xf32>
    %229 = vector.shape_cast %228 : vector<1x49x10xf32> to vector<49x10xf32>
    %cst_31 = arith.constant dense<0.000000e+00> : vector<2x10xf32>
    %230 = tpu.matmul %227, %229, %cst_31 {dimension_numbers = #tpu.dot_dimension_numbers<[1], [0], [0], [1], [0, 0, 1, 1], [], []>} : vector<2x49xf32>, vector<49x10xf32>, vector<2x10xf32> -> vector<2x10xf32>
    %231 = arith.addf %224, %230 : vector<2x10xf32>
    %232 = vector.extract_strided_slice %182 {offsets = [7, 0], sizes = [1, 49], strides = [1, 1]} : vector<16x49xf32> to vector<1x49xf32>
    %233 = vector.extract_strided_slice %183 {offsets = [7, 0], sizes = [1, 49], strides = [1, 1]} : vector<16x49xf32> to vector<1x49xf32>
    %234 = tpu.concatenate %232, %233 in 0 : vector<1x49xf32>, vector<1x49xf32> -> vector<2x49xf32>
    %235 = vector.extract_strided_slice %7 {offsets = [7, 0, 0], sizes = [1, 49, 10], strides = [1, 1, 1]} : vector<16x49x10xf32> to vector<1x49x10xf32>
    %236 = vector.shape_cast %235 : vector<1x49x10xf32> to vector<49x10xf32>
    %cst_32 = arith.constant dense<0.000000e+00> : vector<2x10xf32>
    %237 = tpu.matmul %234, %236, %cst_32 {dimension_numbers = #tpu.dot_dimension_numbers<[1], [0], [0], [1], [0, 0, 1, 1], [], []>} : vector<2x49xf32>, vector<49x10xf32>, vector<2x10xf32> -> vector<2x10xf32>
    %238 = arith.addf %231, %237 : vector<2x10xf32>
    %239 = vector.extract_strided_slice %182 {offsets = [8, 0], sizes = [1, 49], strides = [1, 1]} : vector<16x49xf32> to vector<1x49xf32>
    %240 = vector.extract_strided_slice %183 {offsets = [8, 0], sizes = [1, 49], strides = [1, 1]} : vector<16x49xf32> to vector<1x49xf32>
    %241 = tpu.concatenate %239, %240 in 0 : vector<1x49xf32>, vector<1x49xf32> -> vector<2x49xf32>
    %242 = vector.extract_strided_slice %7 {offsets = [8, 0, 0], sizes = [1, 49, 10], strides = [1, 1, 1]} : vector<16x49x10xf32> to vector<1x49x10xf32>
    %243 = vector.shape_cast %242 : vector<1x49x10xf32> to vector<49x10xf32>
    %cst_33 = arith.constant dense<0.000000e+00> : vector<2x10xf32>
    %244 = tpu.matmul %241, %243, %cst_33 {dimension_numbers = #tpu.dot_dimension_numbers<[1], [0], [0], [1], [0, 0, 1, 1], [], []>} : vector<2x49xf32>, vector<49x10xf32>, vector<2x10xf32> -> vector<2x10xf32>
    %245 = arith.addf %238, %244 : vector<2x10xf32>
    %246 = vector.extract_strided_slice %182 {offsets = [9, 0], sizes = [1, 49], strides = [1, 1]} : vector<16x49xf32> to vector<1x49xf32>
    %247 = vector.extract_strided_slice %183 {offsets = [9, 0], sizes = [1, 49], strides = [1, 1]} : vector<16x49xf32> to vector<1x49xf32>
    %248 = tpu.concatenate %246, %247 in 0 : vector<1x49xf32>, vector<1x49xf32> -> vector<2x49xf32>
    %249 = vector.extract_strided_slice %7 {offsets = [9, 0, 0], sizes = [1, 49, 10], strides = [1, 1, 1]} : vector<16x49x10xf32> to vector<1x49x10xf32>
    %250 = vector.shape_cast %249 : vector<1x49x10xf32> to vector<49x10xf32>
    %cst_34 = arith.constant dense<0.000000e+00> : vector<2x10xf32>
    %251 = tpu.matmul %248, %250, %cst_34 {dimension_numbers = #tpu.dot_dimension_numbers<[1], [0], [0], [1], [0, 0, 1, 1], [], []>} : vector<2x49xf32>, vector<49x10xf32>, vector<2x10xf32> -> vector<2x10xf32>
    %252 = arith.addf %245, %251 : vector<2x10xf32>
    %253 = vector.extract_strided_slice %182 {offsets = [10, 0], sizes = [1, 49], strides = [1, 1]} : vector<16x49xf32> to vector<1x49xf32>
    %254 = vector.extract_strided_slice %183 {offsets = [10, 0], sizes = [1, 49], strides = [1, 1]} : vector<16x49xf32> to vector<1x49xf32>
    %255 = tpu.concatenate %253, %254 in 0 : vector<1x49xf32>, vector<1x49xf32> -> vector<2x49xf32>
    %256 = vector.extract_strided_slice %7 {offsets = [10, 0, 0], sizes = [1, 49, 10], strides = [1, 1, 1]} : vector<16x49x10xf32> to vector<1x49x10xf32>
    %257 = vector.shape_cast %256 : vector<1x49x10xf32> to vector<49x10xf32>
    %cst_35 = arith.constant dense<0.000000e+00> : vector<2x10xf32>
    %258 = tpu.matmul %255, %257, %cst_35 {dimension_numbers = #tpu.dot_dimension_numbers<[1], [0], [0], [1], [0, 0, 1, 1], [], []>} : vector<2x49xf32>, vector<49x10xf32>, vector<2x10xf32> -> vector<2x10xf32>
    %259 = arith.addf %252, %258 : vector<2x10xf32>
    %260 = vector.extract_strided_slice %182 {offsets = [11, 0], sizes = [1, 49], strides = [1, 1]} : vector<16x49xf32> to vector<1x49xf32>
    %261 = vector.extract_strided_slice %183 {offsets = [11, 0], sizes = [1, 49], strides = [1, 1]} : vector<16x49xf32> to vector<1x49xf32>
    %262 = tpu.concatenate %260, %261 in 0 : vector<1x49xf32>, vector<1x49xf32> -> vector<2x49xf32>
    %263 = vector.extract_strided_slice %7 {offsets = [11, 0, 0], sizes = [1, 49, 10], strides = [1, 1, 1]} : vector<16x49x10xf32> to vector<1x49x10xf32>
    %264 = vector.shape_cast %263 : vector<1x49x10xf32> to vector<49x10xf32>
    %cst_36 = arith.constant dense<0.000000e+00> : vector<2x10xf32>
    %265 = tpu.matmul %262, %264, %cst_36 {dimension_numbers = #tpu.dot_dimension_numbers<[1], [0], [0], [1], [0, 0, 1, 1], [], []>} : vector<2x49xf32>, vector<49x10xf32>, vector<2x10xf32> -> vector<2x10xf32>
    %266 = arith.addf %259, %265 : vector<2x10xf32>
    %267 = vector.extract_strided_slice %182 {offsets = [12, 0], sizes = [1, 49], strides = [1, 1]} : vector<16x49xf32> to vector<1x49xf32>
    %268 = vector.extract_strided_slice %183 {offsets = [12, 0], sizes = [1, 49], strides = [1, 1]} : vector<16x49xf32> to vector<1x49xf32>
    %269 = tpu.concatenate %267, %268 in 0 : vector<1x49xf32>, vector<1x49xf32> -> vector<2x49xf32>
    %270 = vector.extract_strided_slice %7 {offsets = [12, 0, 0], sizes = [1, 49, 10], strides = [1, 1, 1]} : vector<16x49x10xf32> to vector<1x49x10xf32>
    %271 = vector.shape_cast %270 : vector<1x49x10xf32> to vector<49x10xf32>
    %cst_37 = arith.constant dense<0.000000e+00> : vector<2x10xf32>
    %272 = tpu.matmul %269, %271, %cst_37 {dimension_numbers = #tpu.dot_dimension_numbers<[1], [0], [0], [1], [0, 0, 1, 1], [], []>} : vector<2x49xf32>, vector<49x10xf32>, vector<2x10xf32> -> vector<2x10xf32>
    %273 = arith.addf %266, %272 : vector<2x10xf32>
    %274 = vector.extract_strided_slice %182 {offsets = [13, 0], sizes = [1, 49], strides = [1, 1]} : vector<16x49xf32> to vector<1x49xf32>
    %275 = vector.extract_strided_slice %183 {offsets = [13, 0], sizes = [1, 49], strides = [1, 1]} : vector<16x49xf32> to vector<1x49xf32>
    %276 = tpu.concatenate %274, %275 in 0 : vector<1x49xf32>, vector<1x49xf32> -> vector<2x49xf32>
    %277 = vector.extract_strided_slice %7 {offsets = [13, 0, 0], sizes = [1, 49, 10], strides = [1, 1, 1]} : vector<16x49x10xf32> to vector<1x49x10xf32>
    %278 = vector.shape_cast %277 : vector<1x49x10xf32> to vector<49x10xf32>
    %cst_38 = arith.constant dense<0.000000e+00> : vector<2x10xf32>
    %279 = tpu.matmul %276, %278, %cst_38 {dimension_numbers = #tpu.dot_dimension_numbers<[1], [0], [0], [1], [0, 0, 1, 1], [], []>} : vector<2x49xf32>, vector<49x10xf32>, vector<2x10xf32> -> vector<2x10xf32>
    %280 = arith.addf %273, %279 : vector<2x10xf32>
    %281 = vector.extract_strided_slice %182 {offsets = [14, 0], sizes = [1, 49], strides = [1, 1]} : vector<16x49xf32> to vector<1x49xf32>
    %282 = vector.extract_strided_slice %183 {offsets = [14, 0], sizes = [1, 49], strides = [1, 1]} : vector<16x49xf32> to vector<1x49xf32>
    %283 = tpu.concatenate %281, %282 in 0 : vector<1x49xf32>, vector<1x49xf32> -> vector<2x49xf32>
    %284 = vector.extract_strided_slice %7 {offsets = [14, 0, 0], sizes = [1, 49, 10], strides = [1, 1, 1]} : vector<16x49x10xf32> to vector<1x49x10xf32>
    %285 = vector.shape_cast %284 : vector<1x49x10xf32> to vector<49x10xf32>
    %cst_39 = arith.constant dense<0.000000e+00> : vector<2x10xf32>
    %286 = tpu.matmul %283, %285, %cst_39 {dimension_numbers = #tpu.dot_dimension_numbers<[1], [0], [0], [1], [0, 0, 1, 1], [], []>} : vector<2x49xf32>, vector<49x10xf32>, vector<2x10xf32> -> vector<2x10xf32>
    %287 = arith.addf %280, %286 : vector<2x10xf32>
    %288 = vector.extract_strided_slice %182 {offsets = [15, 0], sizes = [1, 49], strides = [1, 1]} : vector<16x49xf32> to vector<1x49xf32>
    %289 = vector.extract_strided_slice %183 {offsets = [15, 0], sizes = [1, 49], strides = [1, 1]} : vector<16x49xf32> to vector<1x49xf32>
    %290 = tpu.concatenate %288, %289 in 0 : vector<1x49xf32>, vector<1x49xf32> -> vector<2x49xf32>
    %291 = vector.extract_strided_slice %7 {offsets = [15, 0, 0], sizes = [1, 49, 10], strides = [1, 1, 1]} : vector<16x49x10xf32> to vector<1x49x10xf32>
    %292 = vector.shape_cast %291 : vector<1x49x10xf32> to vector<49x10xf32>
    %cst_40 = arith.constant dense<0.000000e+00> : vector<2x10xf32>
    %293 = tpu.matmul %290, %292, %cst_40 {dimension_numbers = #tpu.dot_dimension_numbers<[1], [0], [0], [1], [0, 0, 1, 1], [], []>} : vector<2x49xf32>, vector<49x10xf32>, vector<2x10xf32> -> vector<2x10xf32>
    %294 = arith.addf %287, %293 : vector<2x10xf32>
    %295 = vector.broadcast %8 : vector<1x10xf32> to vector<2x10xf32>
    %296 = arith.addf %294, %295 : vector<2x10xf32>
    %c0_41 = arith.constant 0 : index
    %c0_42 = arith.constant 0 : index
    %297 = vector.load %arg9[%c0_41, %c0_42] : memref<2x10xf32, #tpu.memory_space<vmem>>, vector<2x10xf32>
    tpu.vector_store %arg9[%c0_41, %c0_42], %296 {strides = array<i32>} : memref<2x10xf32, #tpu.memory_space<vmem>>, vector<2x10xf32>,
    %cst_43 = arith.constant dense<0xFF800000> : vector<2xf32>
    %298 = vector.multi_reduction <maximumf>, %296, %cst_43 [1] : vector<2x10xf32> to vector<2xf32>
    %299 = vector.shape_cast %298 : vector<2xf32> to vector<2x1xf32>
    %300 = vector.broadcast %299 : vector<2x1xf32> to vector<2x10xf32>
    %301 = arith.subf %296, %300 : vector<2x10xf32>
    %302 = math.exp %301 : vector<2x10xf32>
    %cst_44 = arith.constant dense<0.000000e+00> : vector<2xf32>
    %303 = vector.multi_reduction <add>, %302, %cst_44 [1] : vector<2x10xf32> to vector<2xf32>
    %304 = vector.shape_cast %303 : vector<2xf32> to vector<2x1xf32>
    %305 = tpu.reciprocal %304 {approx = true} : vector<2x1xf32> -> vector<2x1xf32>
    %306 = vector.broadcast %305 : vector<2x1xf32> to vector<2x10xf32>
    %307 = arith.mulf %302, %306 : vector<2x10xf32>
    %c0_45 = arith.constant 0 : index
    %c0_46 = arith.constant 0 : index
    %308 = vector.load %arg10[%c0_45, %c0_46] : memref<2x10xf32, #tpu.memory_space<vmem>>, vector<2x10xf32>
    tpu.vector_store %arg10[%c0_45, %c0_46], %307 {strides = array<i32>} : memref<2x10xf32, #tpu.memory_space<vmem>>, vector<2x10xf32>,
    return
  }
}

</mosaic_0001>

<bundles_post_ra>
// kernel: convnet_forward.1
= control target key start
LH: loop header
LB: loop body
LE: loop exit
PB: predicated region body
PF: predicated region fallthrough
CT: control target
= control target key end

     0   :  { %16 = vsyncpa [#allocation3], 0  ;;  %s4191_s0 = inlined_call_operand.vmem [shape: f32[4,512], index: 0, kind: input, shape index: {}]   ;;  %s4192_s1 = inlined_call_operand.vmem [shape: f32[1,512], index: 1, kind: input, shape index: {}]   ;;  %s4193_s2 = inlined_call_operand.vmem [shape: f32[8,9], index: 2, kind: input, shape index: {}]   ;;  %s4194_s3 = inlined_call_operand.vmem [shape: f32[8,1], index: 3, kind: input, shape index: {}]   ;;  %s4195_s4 = inlined_call_operand.vmem [shape: f32[16,72], index: 4, kind: input, shape index: {}]   ;;  %s4196_s5 = inlined_call_operand.vmem [shape: f32[16,1], index: 5, kind: input, shape index: {}]   ;;  %s4197_s6 = inlined_call_operand.vmem [shape: f32[512,98], index: 6, kind: input, shape index: {}]   ;;  %s4198_s7 = inlined_call_operand.vmem [shape: f32[16,49,10], index: 7, kind: input, shape index: {}]   ;;  %s4199_s8 = inlined_call_operand.vmem [shape: f32[1,10], index: 8, kind: input, shape index: {}]   ;;  %s4200_s9 = inlined_call_operand.hbm [shape: f32[2,10], index: 9, kind: output, shape index: {0}]   ;;  %s4201_s10 = inlined_call_operand.hbm [shape: f32[2,10], index: 10, kind: output, shape index: {1}]  }
   0x1   :  { %v2606_v0 = vld [vmem:[%s4191_s0] sm:$0xff]  ;;  %v2611_v1 = vld [vmem:[%s4191_s0 + $0x8] sm:$0xff] }
   0x2   :  { %4222 = vst [vmem:[#allocation8_spill] sm:$0xff] %v2606_v0  ;;  %v2614_v2 = vperm.slane %v2611_v1, 4  ;;  %v2617_v3 = vperm.slane %v2606_v0, 4  ;;  %v2620_v4 = vperm.slane %v2606_v0, 5  ;;  %v2623_v5 = vperm.slane %v2611_v1, 1 }
   0x3   :  { %4223 = vst [vmem:[#allocation9_spill] sm:$0xff] %v2611_v1 }
   0x4   :  { %4224 = vst [vmem:[#allocation10_spill] sm:$0xff] %v2623_v5 }
   0x5   :  { %17 = vsyncpa [#allocation5], 0  ;;  %v2266_v6 = vpack.i.bf16 %v2617_v3, %v2614_v2  ;;  %v2276_v7 = vpack.i.bf16 %v2623_v5, %v2620_v4  ;;  %s2536_s0 = smov 17   ;;  %s2537_s17 = smov 16   ;;  %v2632_v8 = vperm.slane %v2611_v1, 0  ;;  %v2635_v9 = vperm.slane %v2611_v1, 5 }
   0x6   :  { %v2638_v10 = vperm.slane %v2611_v1, 6  ;;  %v2642_v11 = vperm.slane %v2606_v0, 6  ;;  %v4203_v15 = vperm.slane %v2606_v0, 7  ;;  %v4202_v16 = vperm.slane %v2611_v1, 3  ;;  %s2538_s18 = smov 1   ;;  %s2541_s23 = smov 113  }
   0x7   :  { %2267 = vrot.lane.b32.xlu1 %v2266_v6, %s2536_s0  ;;  %2257 = vrot.lane.b32.xlu0 %v2266_v6, %s2537_s17  ;;  %4225 = vst [vmem:[#allocation11_spill] sm:$0xff] %v2635_v9  ;;  %v2271_v12 = vpack.i.bf16 %v2635_v9, %v2632_v8  ;;  %v2655_v17 = vperm.slane %v2611_v1, 2  ;;  %v2658_v18 = vperm.slane %v2611_v1, 7  ;;  %v2675_v22 = vperm.slane %v2606_v0, 0  ;;  %s2542_s24 = smov 112   ;;  %s2543_s25 = smov 127  }
   0x8   :  { %2277 = vrot.lane.b32.xlu2 %v2276_v7, %s2536_s0  ;;  %v2261_v13 = vpack.i.bf16 %v2638_v10, %v2632_v8  ;;  %v2281_v14 = vpack.i.bf16 %v2642_v11, %v2638_v10  ;;  %v2291_v19 = vpack.i.bf16 %v4202_v16, %v4203_v15  ;;  %v2678_v23 = vperm.slane %v2606_v0, 1  ;;  %s2544_s26 = smov 15   ;;  %s2147_s21 = sshll.u32 %s4200_s9, 4  ;;  %s2148_s21 = int_to_ptr.hbm [resolvable:$true] %s2147_s21 }
   0x9   :  { %4226 = vst [vmem:[#allocation12_spill] sm:$0xff] %v2658_v18  ;;  %v2286_v20 = vpack.i.bf16 %v2658_v18, %v2655_v17  ;;  %v2296_v21 = vpack.i.bf16 %v2655_v17, %v2642_v11  ;;  %v2682_v24 = vperm.slane %v2606_v0, 2  ;;  %v2685_v25 = vperm.slane %v2606_v0, 3 }
   0xa   :  { %v2321_v26 = vpack.i.bf16 %v2678_v23, %v2675_v22  ;;  %v2316_v27 = vpack.i.bf16 %v2635_v9, %v2675_v22  ;;  %vm421_vm0 = vcmask 1040384   ;;  %vm237_vm1 = vcmask 138240  }
   0xb   :  { %4227 = vst [vmem:[#allocation13_spill] sm:$0xff] %v2685_v25  ;;  %v2326_v28 = vpack.i.bf16 %v2685_v25, %v2682_v24  ;;  %v2336_v29 = vpack.i.bf16 %v2658_v18, %v2682_v24  ;;  %v2351_v30 = vpack.i.bf16 %v2685_v25, %v2678_v23  ;;  %2176 = vmatpush.msk.msra.mxu2 %vm421_vm0, %v2632_v8  ;;  %vm276_vm2 = vcmask 130048  }
   0xc   :  { %2178 = vmatpush.msk.msra.mxu3 %vm421_vm0, %v2614_v2  ;;  %2172 = vmatpush.msk.msra.mxu0 %vm421_vm0, %v2675_v22  ;;  %vm347_vm3 = vcmask 7168   ;;  %vm426_vm4 = vcmask 1041408   ;;  %vm431_vm5 = vcmask 1042432   ;;  %vm436_vm6 = vcmask 1043456  }
   0xd   :  { %2174 = vmatpush.msk.msra.mxu1 %vm421_vm0, %v2617_v3  ;;  %vm441_vm7 = vcmask 1044480   ;;  %vm446_vm8 = vcmask 1045504   ;;  %vm451_vm9 = vcmask 1046528   ;;  %vm456_vm10 = vcmask 72704  }
   0xe   :  { %vm1278_vm11 = vcmask 908288   ;;  %vm1260_vm12 = vcmask 916480   ;;  %vm1242_vm13 = vcmask 924672   ;;  %vm1224_vm14 = vcmask 1039360  }
   0xf   :  { %2272 = vrot.lane.b32.xlu1 %v2271_v12, %s2536_s0  ;;  %2262 = vrot.lane.b32.xlu0 %v2261_v13, %s2537_s17  ;;  %vm1190_vm15 = vcmask 121856  }
  0x10   :  { %2282 = vrot.lane.b32.xlu2 %v2281_v14, %s2536_s0 }
  0x17   :  { %2292 = vrot.lane.b32.xlu1 %v2291_v19, %s2536_s0  ;;  %2287 = vrot.lane.b32.xlu0 %v2286_v20, %s2536_s0 }
  0x18   :  { %2297 = vrot.lane.b32.xlu2 %v2296_v21, %s2537_s17 }
  0x1f   :  { %2307 = vrot.lane.b32.xlu1 %v2271_v12, %s2538_s18  ;;  %2302 = vrot.lane.b32.xlu0 %v2266_v6, %s2538_s18 }
  0x20   :  { %2312 = vrot.lane.b32.xlu2 %v2276_v7, %s2538_s18 }
  0x27   :  { %2322 = vrot.lane.b32.xlu1 %v2321_v26, %s2536_s0  ;;  %2317 = vrot.lane.b32.xlu0 %v2316_v27, %s2537_s17 }
  0x28   :  { %2327 = vrot.lane.b32.xlu2 %v2326_v28, %s2536_s0 }
  0x2f   :  { %2337 = vrot.lane.b32.xlu1 %v2336_v29, %s2537_s17  ;;  %2332 = vrot.lane.b32.xlu0 %v2276_v7, %s2537_s17 }
  0x30   :  { %2342 = vrot.lane.b32.xlu2 %v2321_v26, %s2538_s18 }
  0x37   :  { %2352 = vrot.lane.b32.xlu1 %v2351_v30, %s2537_s17  ;;  %2347 = vrot.lane.b32.xlu0 %v2291_v19, %s2537_s17 }
  0x38   :  { %2357 = vrot.lane.b32.xlu2 %v2281_v14, %s2538_s18 }
  0x3f   :  { %2367 = vrot.lane.b32.xlu1 %v2291_v19, %s2538_s18  ;;  %2362 = vrot.lane.b32.xlu0 %v2286_v20, %s2538_s18 }
  0x40   :  { %2372 = vrot.lane.b32.xlu2 %v2326_v28, %s2538_s18 }
  0x62   :  { %v2717_v31 = vpop.permute.xlu2 %2277 }
  0x63   :  { %v2280_v34 = vunpack.i.h.bf16 %v2717_v31  ;;  %v4211_v35 = vunpack.i.l.bf16 %v2717_v31 }
  0x65   :  { %v260_v41 = vsel %vm237_vm1, %v4211_v35, %v2280_v34 }
  0x66   :  { %v579_v45 = vrot.slane %v260_v41, 1 }
  0x6a   :  { %v2719_v32 = vpop.permute.xlu2 %2282 }
  0x6b   :  { %v2285_v46 = vunpack.i.h.bf16 %v2719_v32  ;;  %v2284_v47 = vunpack.i.l.bf16 %v2719_v32 }
  0x72   :  { %v2721_v33 = vpop.permute.xlu2 %2297 }
  0x73   :  { %v4205_v36 = vunpack.i.l.bf16 %v2721_v33  ;;  %v2300_v40 = vunpack.i.h.bf16 %v2721_v33 }
  0x75   :  { %v2741_v44 = vsel %vm276_vm2, %v4205_v36, %v2300_v40 }
  0x76   :  { %v397_v56 = vrot.slane %v2741_v44, 5 }
  0x79   :  { %v2726_v37 = vpop.permute.xlu1 %2267  ;;  %v2728_v38 = vpop.permute.xlu0 %2257 }
  0x7a   :  { %v2730_v39 = vpop.permute.xlu2 %2312  ;;  %v4209_v51 = vunpack.i.h.bf16 %v2726_v37  ;;  %v4208_v52 = vunpack.i.l.bf16 %v2726_v37  ;;  %v4207_v53 = vunpack.i.h.bf16 %v2728_v38  ;;  %v4206_v62 = vunpack.i.l.bf16 %v2728_v38 }
  0x7b   :  { %v2315_v42 = vunpack.i.h.bf16 %v2730_v39  ;;  %v2314_v43 = vunpack.i.l.bf16 %v2730_v39 }
  0x7d   :  { %v2752_v50 = vsel %vm347_vm3, %v2314_v43, %v2315_v42 }
  0x7e   :  { %4228 = vst [vmem:[#allocation14_spill] sm:$0xff] %v2752_v50 }
  0x81   :  { %v2757_v54 = vpop.permute.xlu1 %2272  ;;  %v2759_v55 = vpop.permute.xlu0 %2262 }
  0x82   :  { %v4210_v57 = vunpack.i.h.bf16 %v2757_v54  ;;  %v2274_v58 = vunpack.i.l.bf16 %v2757_v54  ;;  %v4204_v59 = vunpack.i.h.bf16 %v2759_v55  ;;  %v2264_v60 = vunpack.i.l.bf16 %v2759_v55  ;;  %v2328_v61 = vpop.permute.xlu2 %2327 }
  0x83   :  { %v2329_v7 = vunpack.i.l.bf16 %v2328_v61  ;;  %v2330_v26 = vunpack.i.h.bf16 %v2328_v61 }
  0x84   :  { %v261_v12 = vsel %vm237_vm1, %v2280_v34, %v4210_v57  ;;  %v239_v13 = vsel %vm237_vm1, %v4209_v51, %v2274_v58  ;;  %v240_v14 = vsel %vm237_vm1, %v2274_v58, %v4208_v52  ;;  %v2781_v19 = vsel %vm276_vm2, %v2300_v40, %v4204_v59 }
  0x85   :  { %v580_v20 = vrot.slane %v261_v12, 1  ;;  %v424_v21 = vsel %vm421_vm0, %v239_v13, %v260_v41  ;;  %v425_v28 = vsel %vm421_vm0, %v240_v14, %v261_v12  ;;  %v278_v29 = vsel %vm276_vm2, %v4207_v53, %v2264_v60 }
  0x86   :  { %v279_v30 = vsel %vm276_vm2, %v2264_v60, %v4206_v62  ;;  %v2795_v34 = vsel %vm237_vm1, %v2329_v7, %v2285_v46  ;;  %v587_v58 = vrot.slane %v278_v29, 7  ;;  %v370_v12 = vrot.slane %v278_v29, 6 }
  0x87   :  { %v588_v61 = vrot.slane %v279_v30, 7  ;;  %v371_v13 = vrot.slane %v279_v30, 6  ;;  %v2802_v14 = vsel %vm237_vm1, %v2284_v47, %v2329_v7  ;;  %v780_v15 = vrot.slane %v2795_v34, 2 }
  0x88   :  { %v2806_v16 = vsel %vm421_vm0, %v579_v45, %v587_v58 }
  0x89   :  { %v2809_v6 = vsel %vm421_vm0, %v580_v20, %v588_v61  ;;  %v2293_v63 = vpop.permute.xlu1 %2292  ;;  %v2288_v40 = vpop.permute.xlu0 %2287 }
  0x8a   :  { %v2295_v48 = vunpack.i.h.bf16 %v2293_v63  ;;  %v2294_v59 = vunpack.i.l.bf16 %v2293_v63  ;;  %v2290_v7 = vunpack.i.h.bf16 %v2288_v40  ;;  %v2343_v36 = vpop.permute.xlu2 %2342  ;;  %v2289_v41 = vunpack.i.l.bf16 %v2288_v40 }
  0x8b   :  { %v2345_v45 = vunpack.i.h.bf16 %v2343_v36  ;;  %v2344_v58 = vunpack.i.l.bf16 %v2343_v36  ;;  %v429_v40 = vsel %vm426_vm4, %v424_v21, %v370_v12  ;;  %v430_v36 = vsel %vm426_vm4, %v425_v28, %v371_v13 }
  0x8c   :  { %v2816_v20 = vsel %vm237_vm1, %v2330_v26, %v2294_v59  ;;  %v2819_v61 = vsel %vm237_vm1, %v2294_v59, %v2295_v48  ;;  %v2822_v49 = vsel %vm237_vm1, %v2295_v48, %v2290_v7  ;;  %v2825_v30 = vsel %vm237_vm1, %v2290_v7, %v2330_v26 }
  0x8d   :  { %v788_v60 = vrot.slane %v2816_v20, 2  ;;  %v388_v62 = vrot.slane %v2819_v61, 7  ;;  %v789_v59 = vrot.slane %v2819_v61, 2  ;;  %v389_v7 = vrot.slane %v2822_v49, 7 }
  0x8e   :  { %v790_v21 = vrot.slane %v2822_v49, 2  ;;  %v296_v13 = vsel %vm237_vm1, %v2285_v46, %v2289_v41  ;;  %v297_v48 = vsel %vm237_vm1, %v2289_v41, %v2284_v47  ;;  %v2850_v51 = vsel %vm347_vm3, %v2345_v45, %v2314_v43 }
  0x8f   :  { %v781_v26 = vrot.slane %v296_v13, 2  ;;  %v782_v53 = vrot.slane %v297_v48, 2  ;;  %v2853_v28 = vsel %vm421_vm0, %v780_v15, %v788_v60  ;;  %v379_v32 = vrot.slane %v296_v13, 7 }
  0x90   :  { %v380_v27 = vrot.slane %v297_v48, 7  ;;  %v4251_v25 = vrot.slane %v2816_v20, 3 }
  0x91   :  { %v2308_v52 = vpop.permute.xlu1 %2307  ;;  %v2303_v63 = vpop.permute.xlu0 %2302  ;;  %v2856_v47 = vsel %vm421_vm0, %v781_v26, %v789_v59  ;;  %v2859_v41 = vsel %vm421_vm0, %v782_v53, %v790_v21  ;;  %v434_v13 = vsel %vm431_vm5, %v429_v40, %v379_v32  ;;  %v4231_v32 = vrot.slane %v2781_v19, 5 }
  0x92   :  { %v2310_v12 = vunpack.i.h.bf16 %v2308_v52  ;;  %v2309_v57 = vunpack.i.l.bf16 %v2308_v52  ;;  %v2305_v46 = vunpack.i.h.bf16 %v2303_v63  ;;  %v2304_v35 = vunpack.i.l.bf16 %v2303_v63  ;;  %4229 = vst [vmem:[#allocation15_spill] sm:$0xff] %v2859_v41  ;;  %v2861_v29 = vpop.permute.xlu2 %2357 }
  0x93   :  { %v439_v53 = vsel %vm436_vm6, %v434_v13, %v388_v62  ;;  %v4232_v59 = vrot.slane %v2752_v50, 2 }
  0x94   :  { %v2866_v43 = vsel %vm347_vm3, %v2315_v42, %v2310_v12  ;;  %v2869_v15 = vsel %vm347_vm3, %v2305_v46, %v2309_v57  ;;  %v2872_v52 = vsel %vm347_vm3, %v2309_v57, %v2304_v35  ;;  %v2875_v60 = vsel %vm347_vm3, %v2310_v12, %v2345_v45 }
  0x95   :  { %4230 = vst [vmem:[#allocation16_spill] sm:$0xff] %v2872_v52  ;;  %v2884_v26 = vsel %vm347_vm3, %v2344_v58, %v2305_v46  ;;  %v2887_v57 = vsel %vm347_vm3, %v2304_v35, %v2344_v58  ;;  %v406_v12 = vrot.slane %v2869_v15, 2  ;;  %v407_v39 = vrot.slane %v2872_v52, 2 }
  0x96   :  { %v416_v63 = vrot.slane %v2866_v43, 2  ;;  %v435_v46 = vsel %vm431_vm5, %v430_v36, %v380_v27  ;;  %v444_v58 = vsel %vm441_vm7, %v439_v53, %v397_v56  ;;  %v4254_v52 = vrot.slane %v2795_v34, 7 }
  0x97   :  { %v440_v21 = vsel %vm436_vm6, %v435_v46, %v389_v7  ;;  %v449_v62 = vsel %vm446_vm8, %v444_v58, %v406_v12  ;;  %v4214_v7 = vunpack.i.h.bf16 %v2861_v29  ;;  %v4233_v12 = vunpack.i.l.bf16 %v2717_v31 }
  0x98   :  { %v445_v13 = vsel %vm441_vm7, %v440_v21, %v4231_v32  ;;  %v454_v35 = vsel %vm451_vm9, %v449_v62, %v4232_v59  ;;  %v4234_v21 = vunpack.i.h.bf16 %v2757_v54  ;;  %v4235_v58 = vunpack.i.h.bf16 %v2726_v37 }
  0x99   :  { %v2323_v42 = vpop.permute.xlu1 %2322  ;;  %v2903_v40 = vpop.permute.xlu0 %2317  ;;  %v450_v45 = vsel %vm446_vm8, %v445_v13, %v407_v39  ;;  %523 = vmatpush.msra.mxu2 %v454_v35  ;;  %v4236_v32 = vunpack.i.l.bf16 %v2726_v37  ;;  %v4237_v13 = vunpack.i.h.bf16 %v2728_v38  ;;  %v4256_v41 = vrot.slane %v2887_v57, 2 }
  0x9a   :  { %v2325_v27 = vunpack.i.h.bf16 %v2323_v42  ;;  %v2324_v36 = vunpack.i.l.bf16 %v2323_v42  ;;  %v2319_v56 = vunpack.i.l.bf16 %v2903_v40  ;;  %v455_v53 = vsel %vm451_vm9, %v450_v45, %v416_v63  ;;  %v2929_v31 = vpop.permute.xlu2 %2372 }
  0x9b   :  { %543 = vmatpush.msra.mxu3 %v455_v53  ;;  %2184 = vmatpush.msk.msrb.mxu2 %vm421_vm0, %v2623_v5  ;;  %v4238_v53 = vunpack.i.l.bf16 %v2728_v38  ;;  %v2374_v38 = vunpack.i.l.bf16 %v2929_v31  ;;  %v4245_v5 = vunpack.i.l.bf16 %v2721_v33  ;;  %v4248_v33 = vunpack.i.l.bf16 %v2861_v29 }
  0x9c   :  { %v259_v46 = vsel %vm237_vm1, %v2325_v27, %v4233_v12  ;;  %v266_v42 = vsel %vm237_vm1, %v4234_v21, %v2325_v27  ;;  %v238_v59 = vsel %vm237_vm1, %v2324_v36, %v4235_v58  ;;  %v245_v35 = vsel %vm237_vm1, %v4236_v32, %v2324_v36 }
  0x9d   :  { %v577_v39 = vrot.slane %v266_v42, 1  ;;  %v578_v62 = vrot.slane %v259_v46, 1  ;;  %v423_v54 = vsel %vm421_vm0, %v238_v59, %v259_v46  ;;  %v277_v27 = vsel %vm276_vm2, %v2319_v56, %v4237_v13  ;;  %2186 = vmatpush.msk.msrb.mxu3 %vm421_vm0, %v2635_v9 }
  0x9e   :  { %v281_v37 = vsel %vm276_vm2, %v4238_v53, %v2319_v56  ;;  %v422_v36 = vsel %vm421_vm0, %v245_v35, %v266_v42  ;;  %v586_v58 = vrot.slane %v277_v27, 7  ;;  %v369_v32 = vrot.slane %v277_v27, 6 }
  0x9f   :  { %v368_v12 = vrot.slane %v281_v37, 6  ;;  %v585_v21 = vrot.slane %v281_v37, 7  ;;  %v4239_v46 = vrot.slane %v2825_v30, 2  ;;  %v4240_v59 = vrot.slane %v2802_v14, 2 }
  0xa0   :  { %v2955_v53 = vsel %vm421_vm0, %v578_v62, %v586_v58  ;;  %v4241_v27 = vrot.slane %v2741_v44, 1  ;;  %v4242_v37 = vrot.slane %v2819_v61, 3  ;;  %v2975_v9 = vsel %vm347_vm3, %v2374_v38, %v4214_v7 }
  0xa1   :  { %v829_v48 = vsel %vm421_vm0, %v4240_v59, %v4239_v46  ;;  %v2952_v56 = vsel %vm421_vm0, %v577_v39, %v585_v21  ;;  %v2338_v42 = vpop.permute.xlu1 %2337  ;;  %v2333_v35 = vpop.permute.xlu0 %2332  ;;  %v4243_v46 = vrot.slane %v2781_v19, 1  ;;  %v4244_v59 = vrot.slane %v2822_v49, 3 }
  0xa2   :  { %v2962_v63 = vsel %vm421_vm0, %v4242_v37, %v4241_v27  ;;  %v2339_v39 = vunpack.i.l.bf16 %v2338_v42  ;;  %v2335_v21 = vunpack.i.h.bf16 %v2333_v35  ;;  %v2334_v62 = vunpack.i.l.bf16 %v2333_v35 }
  0xa3   :  { %v2969_v13 = vsel %vm421_vm0, %v4244_v59, %v4243_v46  ;;  %v2340_v45 = vunpack.i.h.bf16 %v2338_v42  ;;  %v427_v37 = vsel %vm426_vm4, %v422_v36, %v368_v12  ;;  %v4246_v59 = vunpack.i.h.bf16 %v2759_v55 }
  0xa4   :  { %v2982_v46 = vsel %vm276_vm2, %v2339_v39, %v4245_v5  ;;  %v558_v42 = vsel %vm276_vm2, %v2334_v62, %v2335_v21  ;;  %v4247_v58 = vunpack.i.h.bf16 %v2903_v40  ;;  %v2998_v5 = vsel %vm347_vm3, %v4248_v33, %v2374_v38 }
  0xa5   :  { %v2987_v35 = vsel %vm276_vm2, %v4246_v59, %v2339_v39  ;;  %v405_v55 = vrot.slane %v2884_v26, 2  ;;  %v958_v39 = vrot.slane %v2982_v46, 1  ;;  %v596_v59 = vrot.slane %v558_v42, 7 }
  0xa6   :  { %v559_v7 = vsel %vm276_vm2, %v2335_v21, %v4247_v58  ;;  %v957_v12 = vrot.slane %v2987_v35, 1  ;;  %v3005_v21 = vsel %vm426_vm4, %v829_v48, %v2987_v35  ;;  %v3010_v58 = vsel %vm426_vm4, %v2853_v28, %v2982_v46 }
  0xa7   :  { %v597_v18 = vrot.slane %v559_v7, 7  ;;  %v395_v38 = vrot.slane %v2987_v35, 5  ;;  %v4249_v33 = vrot.slane %v2802_v14, 7  ;;  %v637_v27 = vsel %vm426_vm4, %v2806_v16, %v596_v59 }
  0xa8   :  { %v4250_v28 = vrot.slane %v2825_v30, 3  ;;  %v998_v14 = vsel %vm421_vm0, %v4251_v25, %v958_v39  ;;  %v396_v25 = vrot.slane %v2982_v46, 5  ;;  %v414_v39 = vrot.slane %v2850_v51, 2 }
  0xa9   :  { %v432_v36 = vsel %vm431_vm5, %v427_v37, %v4249_v33  ;;  %v638_v7 = vsel %vm426_vm4, %v2809_v6, %v597_v18  ;;  %v2353_v1 = vpop.permute.xlu1 %2352  ;;  %v2348_v37 = vpop.permute.xlu0 %2347  ;;  %v4252_v33 = vrot.slane %v2825_v30, 7  ;;  %v428_v18 = vsel %vm426_vm4, %v423_v54, %v369_v32  ;;  %v3035_v6 = vld [vmem:[%s4193_s2] sm:$0xff] }
  0xaa   :  { %v997_v0 = vsel %vm421_vm0, %v4250_v28, %v957_v12  ;;  %v2355_v59 = vunpack.i.h.bf16 %v2353_v1  ;;  %v2354_v42 = vunpack.i.l.bf16 %v2353_v1  ;;  %v2350_v48 = vunpack.i.h.bf16 %v2348_v37  ;;  %2177 = vmatmul.msk.f32.vlgmr.msra.gmra.mxu2 %vm456_vm10, %v3035_v6  ;;  %2179 = vmatmul.msk.f32.vlgmr.msra.gmra.mxu3 %vm456_vm10, %v3035_v6 }
  0xab   :  { %v437_v16 = vsel %vm436_vm6, %v432_v36, %v4252_v33  ;;  %v2349_v12 = vunpack.i.l.bf16 %v2348_v37  ;;  %v4253_v54 = vunpack.i.h.bf16 %v2903_v40 }
  0xac   :  { %v442_v28 = vsel %vm441_vm7, %v437_v16, %v395_v38  ;;  %v557_v36 = vsel %vm276_vm2, %v2354_v42, %v2334_v62  ;;  %v3045_v33 = vsel %vm276_vm2, %v2340_v45, %v2355_v59  ;;  %v573_v1 = vsel %vm276_vm2, %v2350_v48, %v2340_v45 }
  0xad   :  { %v561_v32 = vsel %vm276_vm2, %v4253_v54, %v2354_v42  ;;  %v595_v37 = vrot.slane %v557_v36, 7  ;;  %v965_v16 = vrot.slane %v3045_v33, 1  ;;  %v433_v62 = vsel %vm431_vm5, %v428_v18, %v4254_v52 }
  0xae   :  { %v594_v38 = vrot.slane %v561_v32, 7  ;;  %v968_v40 = vrot.slane %v573_v1, 1  ;;  %v3057_v42 = vsel %vm276_vm2, %v2355_v59, %v2349_v12  ;;  %v572_v45 = vsel %vm276_vm2, %v2349_v12, %v2350_v48 }
  0xaf   :  { %v621_v54 = vrot.slane %v2752_v50, 3  ;;  %v611_v32 = vrot.slane %v3045_v33, 6  ;;  %v636_v34 = vsel %vm426_vm4, %v2955_v53, %v595_v37  ;;  %v614_v52 = vrot.slane %v573_v1, 6 }
  0xb0   :  { %v635_v36 = vsel %vm426_vm4, %v2952_v56, %v594_v38  ;;  %v3067_v18 = vsel %vm426_vm4, %v997_v0, %v965_v16  ;;  %v3071_v59 = vsel %vm426_vm4, %v2969_v13, %v968_v40  ;;  %v612_v48 = vrot.slane %v3057_v42, 6 }
  0xb1   :  { %4255 = vst [vmem:[#allocation17_spill] sm:$0xff] %v3071_v59  ;;  %v966_v12 = vrot.slane %v3057_v42, 1  ;;  %v613_v50 = vrot.slane %v572_v45, 6  ;;  %v967_v33 = vrot.slane %v572_v45, 1  ;;  %v447_v56 = vsel %vm446_vm8, %v442_v28, %v4256_v41  ;;  %v2368_v0 = vpop.permute.xlu1 %2367  ;;  %v2363_v38 = vpop.permute.xlu0 %2362 }
  0xb2   :  { %v4257_v53 = vrot.slane %v2816_v20, 7  ;;  %v4258_v37 = vrot.slane %v2875_v60, 2  ;;  %v641_v40 = vsel %vm431_vm5, %v637_v27, %v2819_v61  ;;  %v622_v42 = vrot.slane %v2866_v43, 3 }
  0xb3   :  { %v2370_v28 = vunpack.i.h.bf16 %v2368_v0  ;;  %v2369_v45 = vunpack.i.l.bf16 %v2368_v0  ;;  %v2365_v59 = vunpack.i.h.bf16 %v2363_v38  ;;  %v642_v61 = vsel %vm431_vm5, %v638_v7, %v2822_v49 }
  0xb4   :  { %v438_v1 = vsel %vm436_vm6, %v433_v62, %v4257_v53  ;;  %v452_v13 = vsel %vm451_vm9, %v447_v56, %v4258_v37  ;;  %v3090_v62 = vsel %vm426_vm4, %v998_v14, %v966_v12  ;;  %v3099_v27 = vsel %vm426_vm4, %v2962_v63, %v967_v33 }
  0xb5   :  { %v443_v16 = vsel %vm441_vm7, %v438_v1, %v396_v25  ;;  %483 = vmatpush.msra.mxu0 %v452_v13  ;;  %v2364_v25 = vunpack.i.l.bf16 %v2363_v38  ;;  %v4261_v12 = vrot.slane %v2741_v44, 6  ;;  %v3117_v49 = vsel %vm347_vm3, %v2369_v45, %v2370_v28 }
  0xb6   :  { %v448_v41 = vsel %vm446_vm8, %v443_v16, %v405_v55  ;;  %2173 = vmatmul.msk.f32.vlgmr.msra.gmra.mxu0 %vm456_vm10, %v3035_v6  ;;  %v4259_v55 = vunpack.i.h.bf16 %v2929_v31  ;;  %v3121_v7 = vsel %vm347_vm3, %v2370_v28, %v2365_v59  ;;  %v4262_v33 = vunpack.i.h.bf16 %v2861_v29 }
  0xb7   :  { %v453_v53 = vsel %vm451_vm9, %v448_v41, %v414_v39  ;;  %v645_v1 = vsel %vm436_vm6, %v641_v40, %v4261_v12  ;;  %2180 = vmatpush.msk.msrb.mxu0 %vm421_vm0, %v2678_v23  ;;  %v4263_v38 = vunpack.i.l.bf16 %v2861_v29 }
  0xb8   :  { %503 = vmatpush.msra.mxu1 %v453_v53  ;;  %v3104_v56 = vsel %vm347_vm3, %v4259_v55, %v2369_v45  ;;  %v4260_v14 = vmov %v4259_v55  ;;  %v3129_v0 = vsel %vm347_vm3, %v4262_v33, %v2364_v25  ;;  %v649_v13 = vsel %vm441_vm7, %v645_v1, %v613_v50 }
  0xb9   :  { %v3109_v39 = vsel %vm347_vm3, %v2365_v59, %v4260_v14  ;;  %2175 = vmatmul.msk.f32.vlgmr.msra.gmra.mxu1 %vm456_vm10, %v3035_v6  ;;  %v986_v63 = vrot.slane %v3104_v56, 5  ;;  %v3134_v37 = vsel %vm347_vm3, %v2364_v25, %v4263_v38  ;;  %v4264_v59 = vrot.slane %v2781_v19, 6 }
  0xba   :  { %v985_v31 = vrot.slane %v3109_v39, 5  ;;  %2182 = vmatpush.msk.msrb.mxu1 %vm421_vm0, %v2620_v4  ;;  %v814_v40 = vrot.slane %v3129_v0, 4  ;;  %v815_v41 = vrot.slane %v3134_v37, 4  ;;  %v653_v28 = vsel %vm446_vm8, %v649_v13, %v621_v54 }
  0xbb   :  { %v646_v16 = vsel %vm436_vm6, %v642_v61, %v4264_v59  ;;  %v657_v45 = vsel %vm451_vm9, %v653_v28, %v2632_v8  ;;  %v619_v53 = vrot.slane %v2875_v60, 3  ;;  %v639_v25 = vsel %vm431_vm5, %v635_v36, %v2825_v30 }
  0xbc   :  { %v650_v29 = vsel %vm441_vm7, %v646_v16, %v614_v52  ;;  %722 = vmatpush.msrb.mxu2 %v657_v45  ;;  %v4265_v55 = vrot.slane %v2987_v35, 6  ;;  %v620_v52 = vrot.slane %v2850_v51, 3  ;;  %v640_v14 = vsel %vm431_vm5, %v636_v34, %v2816_v20 }
  0xbd   :  { %v654_v50 = vsel %vm446_vm8, %v650_v29, %v622_v42  ;;  %2185 = vmatmul.msk.f32.vlgmr.msrb.gmra.mxu2 %vm456_vm10, %v3035_v6  ;;  %v4266_v30 = vrot.slane %v2982_v46, 6  ;;  %v821_v12 = vrot.slane %v3109_v39, 4  ;;  %v4267_v35 = vrot.slane %v2887_v57, 5 }
  0xbe   :  { %v658_v61 = vsel %vm451_vm9, %v654_v50, %v2614_v2  ;;  %v643_v54 = vsel %vm436_vm6, %v639_v25, %v4265_v55  ;;  %2192 = vmatpush.msk.msra.mxu2 %vm421_vm0, %v2655_v17  ;;  %v4268_v46 = vrot.slane %v2875_v60, 5  ;;  %v822_v33 = vrot.slane %v3104_v56, 4 }
  0xbf   :  { %742 = vmatpush.msrb.mxu3 %v658_v61  ;;  %v647_v42 = vsel %vm441_vm7, %v643_v54, %v611_v32  ;;  %v644_v36 = vsel %vm436_vm6, %v640_v14, %v4266_v30  ;;  %v837_v1 = vsel %vm431_vm5, %v3005_v21, %v4267_v35  ;;  %v4269_v0 = vrot.slane %v2884_v26, 5  ;;  %v4274_v54 = vld [vmem:[#allocation15_spill] sm:$0xff] }
  0xc0   :  { %2187 = vmatmul.msk.f32.vlgmr.msrb.gmra.mxu3 %vm456_vm10, %v3035_v6  ;;  %v651_v20 = vsel %vm446_vm8, %v647_v42, %v619_v53  ;;  %v648_v34 = vsel %vm441_vm7, %v644_v36, %v612_v48  ;;  %v841_v32 = vsel %vm436_vm6, %v837_v1, %v4268_v46  ;;  %v4270_v59 = vrot.slane %v2998_v5, 4 }
  0xc1   :  { %v655_v57 = vsel %vm451_vm9, %v651_v20, %v2675_v22  ;;  %v652_v21 = vsel %vm446_vm8, %v648_v34, %v620_v52  ;;  %2194 = vmatpush.msk.msra.mxu3 %vm421_vm0, %v2638_v10  ;;  %v845_v48 = vsel %vm441_vm7, %v841_v32, %v2675_v22  ;;  %v838_v38 = vsel %vm431_vm5, %v3010_v58, %v4269_v0  ;;  %v4275_v52 = vld [vmem:[#allocation14_spill] sm:$0xff]  ;;  %v4282_v32 = vld [vmem:[#allocation8_spill] sm:$0xff] }
  0xc2   :  { %682 = vmatpush.msrb.mxu0 %v655_v57  ;;  %v656_v13 = vsel %vm451_vm9, %v652_v21, %v2617_v3  ;;  %v849_v16 = vsel %vm446_vm8, %v845_v48, %v4270_v59  ;;  %v4271_v28 = vrot.slane %v2850_v51, 5  ;;  %v823_v45 = vrot.slane %v3117_v49, 4  ;;  %v4289_v59 = vld [vmem:[#allocation17_spill] sm:$0xff] }
  0xc3   :  { %702 = vmatpush.msrb.mxu1 %v656_v13  ;;  %2181 = vmatmul.msk.f32.vlgmr.msrb.gmra.mxu0 %vm456_vm10, %v3035_v6  ;;  %v853_v26 = vsel %vm451_vm9, %v849_v16, %v821_v12  ;;  %v835_v5 = vsel %vm426_vm4, %v2856_v47, %v2741_v44  ;;  %v824_v50 = vrot.slane %v3121_v7, 4  ;;  %v4272_v53 = vrot.slane %v2975_v9, 4  ;;  %v4277_v9 = vld [vmem:[#allocation16_spill] sm:$0xff] }
  0xc4   :  { %v842_v29 = vsel %vm436_vm6, %v838_v38, %v4271_v28  ;;  %2188 = vmatpush.msk.msra.mxu0 %vm421_vm0, %v2682_v24  ;;  %v4273_v61 = vrot.slane %v2869_v15, 5  ;;  %v836_v44 = vsel %vm426_vm4, %v4274_v54, %v2781_v19  ;;  %2183 = vmatmul.msk.f32.vlgmr.msrb.gmra.mxu1 %vm456_vm10, %v3035_v6  ;;  %v4276_v14 = vrot.slane %v4275_v52, 5  ;;  %v4290_v16 = vld [vmem:[#allocation12_spill] sm:$0xff]  ;;  %v4291_v28 = vld [vmem:[#allocation10_spill] sm:$0xff] }
  0xc5   :  { %v846_v58 = vsel %vm441_vm7, %v842_v29, %v2617_v3  ;;  %2190 = vmatpush.msk.msra.mxu1 %vm421_vm0, %v2642_v11  ;;  %v4278_v30 = vrot.slane %v4277_v9, 5  ;;  %v4279_v15 = vrot.slane %v2875_v60, 6  ;;  %v987_v19 = vrot.slane %v3117_v49, 5  ;;  %v4281_v49 = vld [vmem:[#allocation13_spill] sm:$0xff] }
  0xc6   :  { %v850_v25 = vsel %vm446_vm8, %v846_v58, %v4272_v53  ;;  %v839_v55 = vsel %vm431_vm5, %v835_v5, %v4273_v61  ;;  %880 = vmatpush.msra.mxu0 %v853_v26  ;;  %v4280_v1 = vrot.slane %v2866_v43, 5  ;;  %v988_v46 = vrot.slane %v3121_v7, 5 }
  0xc7   :  { %v854_v47 = vsel %vm451_vm9, %v850_v25, %v822_v33  ;;  %v843_v42 = vsel %vm436_vm6, %v839_v55, %v4276_v14  ;;  %v840_v36 = vsel %vm431_vm5, %v836_v44, %v4278_v30  ;;  %v1005_v12 = vsel %vm431_vm5, %v3067_v18, %v4279_v15 }
  0xc8   :  { %900 = vmatpush.msra.mxu1 %v854_v47  ;;  %v847_v35 = vsel %vm441_vm7, %v843_v42, %v2632_v8  ;;  %v844_v20 = vsel %vm436_vm6, %v840_v36, %v4280_v1  ;;  %v1009_v34 = vsel %vm436_vm6, %v1005_v12, %v2675_v22  ;;  %2196 = vmatpush.msk.msrb.mxu0 %vm421_vm0, %v4281_v49  ;;  %v4283_v33 = vperm.slane %v4282_v32, 7 }
  0xc9   :  { %v851_v60 = vsel %vm446_vm8, %v847_v35, %v814_v40  ;;  %v848_v18 = vsel %vm441_vm7, %v844_v20, %v2614_v2  ;;  %v1013_v57 = vsel %vm441_vm7, %v1009_v34, %v2678_v23  ;;  %v4284_v40 = vrot.slane %v2850_v51, 6  ;;  %v4286_v51 = vld [vmem:[#allocation9_spill] sm:$0xff] }
  0xca   :  { %2198 = vmatpush.msk.msrb.mxu1 %vm421_vm0, %v4283_v33  ;;  %v855_v21 = vsel %vm451_vm9, %v851_v60, %v823_v45  ;;  %v852_v22 = vsel %vm446_vm8, %v848_v18, %v815_v41  ;;  %v1017_v7 = vsel %vm446_vm8, %v1013_v57, %v985_v31  ;;  %v2539_v0 = vmov 0   ;;  %v4292_v45 = vld [vmem:[#allocation11_spill] sm:$0xff] }
  0xcb   :  { %v1006_v48 = vsel %vm431_vm5, %v3090_v62, %v4284_v40  ;;  %2376 = vset.pattern.permute.xlu0 %v2539_v0  ;;  %920 = vmatpush.msra.mxu2 %v855_v21  ;;  %v856_v23 = vsel %vm451_vm9, %v852_v22, %v824_v50  ;;  %v1021_v38 = vsel %vm451_vm9, %v1017_v7, %v2682_v24  ;;  %v4285_v39 = vrot.slane %v4275_v52, 6 }
  0xcc   :  { %v1010_v37 = vsel %vm436_vm6, %v1006_v48, %v2617_v3  ;;  %940 = vmatpush.msra.mxu3 %v856_v23  ;;  %v4287_v41 = vperm.slane %v4286_v51, 3  ;;  %v4288_v24 = vrot.slane %v2866_v43, 6  ;;  %2193 = vmatmul.msk.f32.vlgmr.msra.gmra.mxu2 %vm456_vm10, %v3035_v6 }
  0xcd   :  { %v1007_v31 = vsel %vm431_vm5, %v3099_v27, %v4285_v39  ;;  %v1014_v62 = vsel %vm441_vm7, %v1010_v37, %v2620_v4  ;;  %2195 = vmatmul.msk.f32.vlgmr.msra.gmra.mxu3 %vm456_vm10, %v3035_v6  ;;  %1048 = vmatpush.msrb.mxu0 %v1021_v38 }
  0xce   :  { %2200 = vmatpush.msk.msrb.mxu2 %vm421_vm0, %v4287_v41  ;;  %v1011_v13 = vsel %vm436_vm6, %v1007_v31, %v2632_v8  ;;  %v1008_v3 = vsel %vm431_vm5, %v4289_v59, %v4288_v24  ;;  %2202 = vmatpush.msk.msrb.mxu3 %vm421_vm0, %v4290_v16  ;;  %v1018_v27 = vsel %vm446_vm8, %v1014_v62, %v986_v63  ;;  %v40_v63 = vld [vmem:[%s4194_s3] sm:$0xff]  ;;  %s2546_s3 = smov [#allocation2]  }
  0xcf   :  { %v1015_v4 = vsel %vm441_vm7, %v1011_v13, %v4291_v28  ;;  %v1012_v8 = vsel %vm436_vm6, %v1008_v3, %v2614_v2  ;;  %v1022_v43 = vsel %vm451_vm9, %v1018_v27, %v2642_v11  ;;  %2189 = vmatmul.msk.f32.vlgmr.msra.gmra.mxu0 %vm456_vm10, %v3035_v6  ;;  %2191 = vmatmul.msk.f32.vlgmr.msra.gmra.mxu1 %vm456_vm10, %v3035_v6  ;;  %s2145_s22 = sshll.u32 %s2546_s3, 4  ;;  %s2146_s22 = int_to_ptr.vmem [resolvable:$true] %s2145_s22 }
  0xd0   :  { %v1019_v29 = vsel %vm446_vm8, %v1015_v4, %v987_v19  ;;  %v1016_v56 = vsel %vm441_vm7, %v1012_v8, %v4292_v45  ;;  %1068 = vmatpush.msrb.mxu1 %v1022_v43  ;;  %1119 = vperm.xlu0 %2376, %v40_v63  }
  0xd1   :  { %v1023_v2 = vsel %vm451_vm9, %v1019_v29, %v2655_v17  ;;  %v1020_v26 = vsel %vm446_vm8, %v1016_v56, %v988_v46  ;;  %2437 = vset.pattern.permute.xlu1 %v2539_v0  ;;  %2438 = vset.pattern.permute.xlu2 %v2539_v0 }
  0xd2   :  { %1088 = vmatpush.msrb.mxu2 %v1023_v2  ;;  %v1024_v11 = vsel %vm451_vm9, %v1020_v26, %v2638_v10 }
  0xd3   :  { %1108 = vmatpush.msrb.mxu3 %v1024_v11 }
  0xd4   :  { %2201 = vmatmul.msk.f32.vlgmr.msrb.gmra.mxu2 %vm456_vm10, %v3035_v6 }
  0xd5   :  { %2203 = vmatmul.msk.f32.vlgmr.msrb.gmra.mxu3 %vm456_vm10, %v3035_v6 }
  0xd7   :  { %2197 = vmatmul.msk.f32.vlgmr.msrb.gmra.mxu0 %vm456_vm10, %v3035_v6  ;;  %2199 = vmatmul.msk.f32.vlgmr.msrb.gmra.mxu1 %vm456_vm10, %v3035_v6  ;;  %v38_v6 = vld [vmem:[%s4192_s1] sm:$0xf]  ;;  %s2540_s1 = smov 111  }
  0xd8   :  { %v1131_v34 = vperm.slane %v38_v6, 0  ;;  %v1133_v40 = vperm.slane %v38_v6, 2  ;;  %v1132_v0 = vperm.slane %v38_v6, 1  ;;  %v1134_v38 = vperm.slane %v38_v6, 3 }
 0x12d   :  { %v525_v58 = vpop.f32.mrf.mxu2  ;;  %v545_v5 = vpop.f32.mrf.mxu3 }
 0x133   :  { %v485_v10 = vpop.f32.mrf.mxu0 }
 0x136   :  { %v505_v17 = vpop.f32.mrf.mxu1 }
 0x140   :  { %v684_v50 = vpop.f32.mrf.mxu0  ;;  %v724_v25 = vpop.f32.mrf.mxu2 }
 0x141   :  { %v704_v53 = vpop.f32.mrf.mxu1  ;;  %v747_v52 = vmax.f32 %v485_v10, %v684_v50  ;;  %v749_v12 = vmax.f32 %v525_v58, %v724_v25 }
 0x142   :  { %v748_v44 = vmax.f32 %v505_v17, %v704_v53  ;;  %v1120_v15 = vpop.permute.xlu0 %1119 }
 0x143   :  { %v744_v61 = vpop.f32.mrf.mxu3 }
 0x144   :  { %v750_v30 = vmax.f32 %v545_v5, %v744_v61 }
 0x14c   :  { %v882_v55 = vpop.f32.mrf.mxu0  ;;  %v902_v54 = vpop.f32.mrf.mxu1 }
 0x14d   :  { %v946_v42 = vmax.f32 %v748_v44, %v902_v54  ;;  %v945_v9 = vmax.f32 %v747_v52, %v882_v55 }
 0x14f   :  { %v922_v47 = vpop.f32.mrf.mxu2 }
 0x150   :  { %v942_v14 = vpop.f32.mrf.mxu3  ;;  %v947_v20 = vmax.f32 %v749_v12, %v922_v47 }
 0x151   :  { %v948_v60 = vmax.f32 %v750_v30, %v942_v14 }
 0x154   :  { %v1050_v36 = vpop.f32.mrf.mxu0  ;;  %v1070_v35 = vpop.f32.mrf.mxu1 }
 0x155   :  { %v1113_v19 = vmax.f32 %v945_v9, %v1050_v36  ;;  %v1114_v1 = vmax.f32 %v946_v42, %v1070_v35 }
 0x157   :  { %v1122_v46 = vadd.f32 %v1120_v15, %v1113_v19  ;;  %v1123_v18 = vadd.f32 %v1120_v15, %v1114_v1  ;;  %v1090_v49 = vpop.f32.mrf.mxu2 }
 0x158   :  { %v1115_v33 = vmax.f32 %v947_v20, %v1090_v49  ;;  %v1110_v57 = vpop.f32.mrf.mxu3 }
 0x159   :  { %v1126_v32 = vmax.f32 %v1122_v46, 0.0  ;;  %v1116_v21 = vmax.f32 %v948_v60, %v1110_v57  ;;  %v1127_v48 = vmax.f32 %v1123_v18, 0.0 }
 0x15a   :  { %v1124_v7 = vadd.f32 %v1120_v15, %v1115_v33 }
 0x15b   :  { %v3327_v22 = vmul.f32 %v1131_v34, %v1126_v32  ;;  %v1125_v23 = vadd.f32 %v1120_v15, %v1116_v21  ;;  %v3333_v51 = vmul.f32 %v1132_v0, %v1127_v48  ;;  %v43_v48 = vld [vmem:[%s4196_s5] sm:$0xff]  ;;  %v44_v0 = vld [vmem:[%s4196_s5 + $0x8] sm:$0xff] }
 0x15c   :  { %v1128_v37 = vmax.f32 %v1124_v7, 0.0 }
 0x15d   :  { %1202 = vrot.lane.b32.xlu0 %v3327_v22, %s2538_s18  ;;  %v1129_v39 = vmax.f32 %v1125_v23, 0.0 }
 0x15e   :  { %v3331_v31 = vmul.f32 %v1133_v40, %v1128_v37 }
 0x15f   :  { %v3335_v41 = vmul.f32 %v1134_v38, %v1129_v39 }
 0x160   :  { %v2377_v62 = vpack.i.bf16 %v3331_v31, %v3327_v22 }
 0x161   :  { %v2382_v13 = vpack.i.bf16 %v3333_v51, %v3335_v41 }
 0x162   :  { %2378 = vrot.lane.b32.xlu1 %v2377_v62, %s2540_s1 }
 0x163   :  { %2383 = vrot.lane.b32.xlu2 %v2382_v13, %s2540_s1 }
 0x165   :  { %2398 = vrot.lane.b32.xlu0 %v2377_v62, %s2541_s23 }
 0x16a   :  { %2388 = vrot.lane.b32.xlu1 %v2377_v62, %s2542_s24 }
 0x16b   :  { %2393 = vrot.lane.b32.xlu2 %v2382_v13, %s2542_s24 }
 0x16d   :  { %2413 = vrot.lane.b32.xlu0 %v2382_v13, %s2543_s25 }
 0x172   :  { %2403 = vrot.lane.b32.xlu1 %v2382_v13, %s2541_s23 }
 0x173   :  { %2408 = vrot.lane.b32.xlu2 %v2377_v62, %s2543_s25 }
 0x175   :  { %2423 = vrot.lane.b32.xlu0 %v2382_v13, %s2544_s26 }
 0x17a   :  { %2418 = vrot.lane.b32.xlu1 %v2382_v13, %s2538_s18 }
 0x17b   :  { %1206 = vrot.lane.b32.xlu2 %v3331_v31, %s2538_s18 }
 0x17d   :  { %1171 = vrot.lane.b32.xlu0 %v3331_v31, %s2537_s17 }
 0x182   :  { %1188 = vrot.lane.b32.xlu1 %v3331_v31, %s2544_s26 }
 0x183   :  { %2428 = vrot.lane.b32.xlu2 %v2382_v13, %s2537_s17 }
 0x185   :  { %1150 = vrot.lane.b32.xlu0 %v3327_v22, %s2536_s0 }
 0x18a   :  { %2433 = vrot.lane.b32.xlu1 %v2382_v13, %s2536_s0 }
 0x18b   :  { %1154 = vrot.lane.b32.xlu2 %v3331_v31, %s2536_s0 }
 0x192   :  { %1184 = vrot.lane.b32.xlu1 %v3327_v22, %s2544_s26 }
 0x193   :  { %1167 = vrot.lane.b32.xlu2 %v3327_v22, %s2537_s17 }
 0x19a   :  { %1290 = vperm.xlu1 %2437, %v43_v48   ;;  %v56_v48 = vld [vmem:[%s4197_s6 + $0x58] sm:$0xff] }
 0x19b   :  { %1295 = vperm.xlu2 %2438, %v44_v0   ;;  %v55_v0 = vld [vmem:[%s4197_s6 + $0x50] sm:$0xff] }
 0x1bd   :  { %v2384_v24 = vpop.permute.xlu2 %2383 }
 0x1be   :  { %v2386_v27 = vunpack.i.h.bf16 %v2384_v24  ;;  %v2385_v8 = vunpack.i.l.bf16 %v2384_v24 }
 0x1c5   :  { %v2394_v3 = vpop.permute.xlu2 %2393 }
 0x1c6   :  { %v2396_v11 = vunpack.i.h.bf16 %v2394_v3  ;;  %v2395_v58 = vunpack.i.l.bf16 %v2394_v3 }
 0x1cd   :  { %v2409_v2 = vpop.permute.xlu2 %2408 }
 0x1ce   :  { %v2411_v30 = vunpack.i.h.bf16 %v2409_v2  ;;  %v2410_v36 = vunpack.i.l.bf16 %v2409_v2 }
 0x1cf   :  { %v3360_v59 = vpop.permute.xlu0 %1202 }
 0x1d4   :  { %v2379_v16 = vpop.permute.xlu1 %2378 }
 0x1d5   :  { %v2381_v28 = vunpack.i.h.bf16 %v2379_v16  ;;  %v2380_v4 = vunpack.i.l.bf16 %v2379_v16  ;;  %v1207_v42 = vpop.permute.xlu2 %1206  ;;  %v41_v16 = vld [vmem:[%s4195_s4] sm:$0xff] }
 0x1d7   :  { %v2399_v43 = vpop.permute.xlu0 %2398  ;;  %v1279_v29 = vsel %vm1278_vm11, %v2380_v4, %v2386_v27  ;;  %v1280_v45 = vsel %vm1278_vm11, %v2386_v27, %v2381_v28  ;;  %v1281_v56 = vsel %vm1278_vm11, %v2381_v28, %v2385_v8  ;;  %v1287_v63 = vsel %vm1278_vm11, %v2385_v8, %v2380_v4 }
 0x1d8   :  { %1312 = vmatpush.msra.mxu0 %v1279_v29  ;;  %1335 = vmatpush.msra.mxu1 %v1280_v45  ;;  %v2401_v55 = vunpack.i.h.bf16 %v2399_v43  ;;  %v2400_v44 = vunpack.i.l.bf16 %v2399_v43  ;;  %v42_v45 = vld [vmem:[%s4195_s4 + $0x8] sm:$0xff] }
 0x1d9   :  { %1358 = vmatpush.msra.mxu2 %v1281_v56  ;;  %1381 = vmatpush.msra.mxu3 %v1287_v63 }
 0x1dc   :  { %v2389_v26 = vpop.permute.xlu1 %2388 }
 0x1dd   :  { %v2391_v10 = vunpack.i.h.bf16 %v2389_v26  ;;  %v2390_v17 = vunpack.i.l.bf16 %v2389_v26  ;;  %v2429_v7 = vpop.permute.xlu2 %2428 }
 0x1de   :  { %v2431_v37 = vunpack.i.h.bf16 %v2429_v7  ;;  %v2430_v39 = vunpack.i.l.bf16 %v2429_v7  ;;  %v76_v7 = vld [vmem:[%s4197_s6 + $0xf8] sm:$0xff] }
 0x1df   :  { %v1261_v5 = vsel %vm1260_vm12, %v2390_v17, %v2396_v11  ;;  %v1262_v50 = vsel %vm1260_vm12, %v2396_v11, %v2391_v10  ;;  %v2414_v53 = vpop.permute.xlu0 %2413  ;;  %v1263_v25 = vsel %vm1260_vm12, %v2391_v10, %v2395_v58  ;;  %v1269_v61 = vsel %vm1260_vm12, %v2395_v58, %v2390_v17 }
 0x1e0   :  { %1313 = vmatpush.msra.mxu0 %v1261_v5  ;;  %1336 = vmatpush.msra.mxu1 %v1262_v50  ;;  %v2416_v47 = vunpack.i.h.bf16 %v2414_v53  ;;  %v2415_v9 = vunpack.i.l.bf16 %v2414_v53 }
 0x1e1   :  { %1359 = vmatpush.msra.mxu2 %v1263_v25  ;;  %1382 = vmatpush.msra.mxu3 %v1269_v61 }
 0x1e2   :  { %v1225_v35 = vsel %vm1224_vm14, %v2410_v36, %v2416_v47  ;;  %v1226_v1 = vsel %vm1224_vm14, %v2416_v47, %v2411_v30  ;;  %v1227_v34 = vsel %vm1224_vm14, %v2411_v30, %v2415_v9  ;;  %v1233_v46 = vsel %vm1224_vm14, %v2415_v9, %v2410_v36 }
 0x1e4   :  { %v2404_v54 = vpop.permute.xlu1 %2403 }
 0x1e5   :  { %v2406_v52 = vunpack.i.h.bf16 %v2404_v54  ;;  %v2405_v14 = vunpack.i.l.bf16 %v2404_v54  ;;  %v1155_v13 = vpop.permute.xlu2 %1154 }
 0x1e7   :  { %v1243_v6 = vsel %vm1242_vm13, %v2400_v44, %v2406_v52  ;;  %v1244_v15 = vsel %vm1242_vm13, %v2406_v52, %v2401_v55  ;;  %v1245_v12 = vsel %vm1242_vm13, %v2401_v55, %v2405_v14  ;;  %v1251_v19 = vsel %vm1242_vm13, %v2405_v14, %v2400_v44  ;;  %v2424_v20 = vpop.permute.xlu0 %2423 }
 0x1e8   :  { %1314 = vmatpush.msra.mxu0 %v1243_v6  ;;  %1337 = vmatpush.msra.mxu1 %v1244_v15  ;;  %v2425_v40 = vunpack.i.l.bf16 %v2424_v20 }
 0x1e9   :  { %1360 = vmatpush.msra.mxu2 %v1245_v12  ;;  %1383 = vmatpush.msra.mxu3 %v1251_v19 }
 0x1ea   :  { %1315 = vmatpush.msra.mxu0 %v1225_v35  ;;  %1338 = vmatpush.msra.mxu1 %v1226_v1 }
 0x1eb   :  { %1361 = vmatpush.msra.mxu2 %v1227_v34  ;;  %1384 = vmatpush.msra.mxu3 %v1233_v46 }
 0x1ec   :  { %v2419_v60 = vpop.permute.xlu1 %2418  ;;  %1316 = vmatpush.msra.mxu0 %v3327_v22  ;;  %1339 = vmatpush.msra.mxu1 %v3333_v51  ;;  %v2426_v22 = vunpack.i.h.bf16 %v2424_v20 }
 0x1ed   :  { %v2421_v18 = vunpack.i.h.bf16 %v2419_v60  ;;  %v2420_v49 = vunpack.i.l.bf16 %v2419_v60  ;;  %1362 = vmatpush.msra.mxu2 %v3331_v31  ;;  %1385 = vmatpush.msra.mxu3 %v3335_v41  ;;  %v1168_v4 = vpop.permute.xlu2 %1167 }
 0x1ee   :  { %v1180_v56 = vsel %vm276_vm2, %v2430_v39, %v1168_v4  ;;  %v1173_v63 = vsel %vm276_vm2, %v1168_v4, %v2431_v37 }
 0x1ef   :  { %v1215_v32 = vsel %vm347_vm3, %v2420_v49, %v3360_v59  ;;  %v1208_v33 = vsel %vm347_vm3, %v3360_v59, %v2421_v18  ;;  %v1209_v57 = vsel %vm347_vm3, %v2421_v18, %v1207_v42  ;;  %v1210_v21 = vsel %vm347_vm3, %v1207_v42, %v2420_v49  ;;  %v1172_v23 = vpop.permute.xlu0 %1171 }
 0x1f0   :  { %1317 = vmatpush.msra.mxu0 %v1215_v32  ;;  %1340 = vmatpush.msra.mxu1 %v1208_v33  ;;  %v1174_v41 = vsel %vm276_vm2, %v2431_v37, %v1172_v23  ;;  %v1175_v62 = vsel %vm276_vm2, %v1172_v23, %v2430_v39  ;;  %vm1298_vm3 = vcmask 588800   ;;  %v60_v32 = vld [vmem:[%s4197_s6 + $0x78] sm:$0xff]  ;;  %v59_v33 = vld [vmem:[%s4197_s6 + $0x70] sm:$0xff]  ;;  %v54_v23 = vld [vmem:[%s4197_s6 + $0x48] sm:$0xff] }
 0x1f1   :  { %1363 = vmatpush.msra.mxu2 %v1209_v57  ;;  %1386 = vmatpush.msra.mxu3 %v1210_v21  ;;  %v58_v57 = vld [vmem:[%s4197_s6 + $0x68] sm:$0xff]  ;;  %v57_v21 = vld [vmem:[%s4197_s6 + $0x60] sm:$0xff]  ;;  %v52_v37 = vld [vmem:[%s4197_s6 + $0x38] sm:$0xff] }
 0x1f4   :  { %v1189_v38 = vpop.permute.xlu1 %1188 }
 0x1f5   :  { %v1192_v31 = vsel %vm1190_vm15, %v2426_v22, %v1189_v38  ;;  %v1193_v51 = vsel %vm1190_vm15, %v1189_v38, %v2425_v40  ;;  %v1296_v47 = vpop.permute.xlu2 %1295  ;;  %v53_v38 = vld [vmem:[%s4197_s6 + $0x40] sm:$0xff] }
 0x1f6   :  { %1364 = vmatpush.msra.mxu2 %v1192_v31  ;;  %1387 = vmatpush.msra.mxu3 %v1193_v51  ;;  %v51_v51 = vld [vmem:[%s4197_s6 + $0x30] sm:$0xff] }
 0x1f7   :  { %v1151_v2 = vpop.permute.xlu0 %1150 }
 0x1f8   :  { %1365 = vmatpush.msra.mxu2 %v1174_v41  ;;  %1388 = vmatpush.msra.mxu3 %v1175_v62 }
 0x1fc   :  { %v2434_v24 = vpop.permute.xlu1 %2433 }
 0x1fd   :  { %v2436_v59 = vunpack.i.h.bf16 %v2434_v24  ;;  %v2435_v3 = vunpack.i.l.bf16 %v2434_v24 }
 0x1ff   :  { %v1157_v27 = vsel %vm237_vm1, %v2436_v59, %v1155_v13  ;;  %v1158_v28 = vsel %vm237_vm1, %v1155_v13, %v2435_v3  ;;  %v1163_v26 = vsel %vm237_vm1, %v2435_v3, %v1151_v2  ;;  %v1156_v11 = vsel %vm237_vm1, %v1151_v2, %v2436_v59  ;;  %v50_v59 = vld [vmem:[%s4197_s6 + $0x28] sm:$0xff] }
 0x200   :  { %1366 = vmatpush.msra.mxu2 %v1157_v27  ;;  %1389 = vmatpush.msra.mxu3 %v1158_v28  ;;  %vm1609_vm1 = vcmask 400384  }
 0x201   :  { %2208 = vmatmul.msk.f32.vlgmr.msra.gmra.mxu2 %vm1298_vm3, %v41_v16  ;;  %2210 = vmatmul.msk.f32.vlgmr.msra.gmra.mxu3 %vm1298_vm3, %v41_v16 }
 0x204   :  { %v1185_v8 = vpop.permute.xlu1 %1184 }
 0x205   :  { %v1198_v43 = vsel %vm1190_vm15, %v2425_v40, %v1185_v8  ;;  %v1191_v29 = vsel %vm1190_vm15, %v1185_v8, %v2426_v22  ;;  %v92_v22 = vld [vmem:[%s4197_s6 + $0x178] sm:$0xff] }
 0x206   :  { %1318 = vmatpush.msra.mxu0 %v1198_v43  ;;  %1341 = vmatpush.msra.mxu1 %v1191_v29  ;;  %v108_v40 = vld [vmem:[%s4197_s6 + $0x1f8] sm:$0xff] }
 0x207   :  { %1551 = vmatpush.msrb.mxu2 %v92_v22  ;;  %1574 = vmatpush.msrb.mxu3 %v108_v40  ;;  %v69_v22 = vld [vmem:[%s4197_s6 + $0xc0] sm:$0xff] }
 0x208   :  { %1319 = vmatpush.msra.mxu0 %v1180_v56  ;;  %1342 = vmatpush.msra.mxu1 %v1173_v63  ;;  %v85_v40 = vld [vmem:[%s4197_s6 + $0x140] sm:$0xff] }
 0x209   :  { %2211 = vmatmul.msk.f32.gmra.mxu3 %vm1298_vm3, %v42_v45  ;;  %2209 = vmatmul.msk.f32.gmra.mxu2 %vm1298_vm3, %v42_v45 }
 0x20a   :  { %1320 = vmatpush.msra.mxu0 %v1163_v26  ;;  %1343 = vmatpush.msra.mxu1 %v1156_v11  ;;  %v48_v26 = vld [vmem:[%s4197_s6 + $0x18] sm:$0xff] }
 0x20b   :  { %2204 = vmatmul.msk.f32.vlgmr.msra.gmra.mxu0 %vm1298_vm3, %v41_v16  ;;  %2206 = vmatmul.msk.f32.vlgmr.msra.gmra.mxu1 %vm1298_vm3, %v41_v16 }
 0x20c   :  { %v1291_v10 = vpop.permute.xlu1 %1290  ;;  %1505 = vmatpush.msrb.mxu0 %v60_v32  ;;  %1528 = vmatpush.msrb.mxu1 %v76_v7  ;;  %v87_v32 = vld [vmem:[%s4197_s6 + $0x150] sm:$0xff]  ;;  %v102_v7 = vld [vmem:[%s4197_s6 + $0x1c8] sm:$0xff] }
 0x20e   :  { %1506 = vmatpush.msrb.mxu0 %v59_v33  ;;  %v103_v33 = vld [vmem:[%s4197_s6 + $0x1d0] sm:$0xff] }
 0x210   :  { %1507 = vmatpush.msrb.mxu0 %v58_v57  ;;  %v70_v57 = vld [vmem:[%s4197_s6 + $0xc8] sm:$0xff] }
 0x212   :  { %1508 = vmatpush.msrb.mxu0 %v57_v21  ;;  %v86_v21 = vld [vmem:[%s4197_s6 + $0x148] sm:$0xff] }
 0x213   :  { %2207 = vmatmul.msk.f32.gmra.mxu1 %vm1298_vm3, %v42_v45  ;;  %2205 = vmatmul.msk.f32.gmra.mxu0 %vm1298_vm3, %v42_v45  ;;  %v49_v45 = vld [vmem:[%s4197_s6 + $0x20] sm:$0xff] }
 0x214   :  { %1509 = vmatpush.msrb.mxu0 %v56_v48  ;;  %v101_v48 = vld [vmem:[%s4197_s6 + $0x1c0] sm:$0xff] }
 0x216   :  { %1510 = vmatpush.msrb.mxu0 %v55_v0  ;;  %v68_v0 = vld [vmem:[%s4197_s6 + $0xb8] sm:$0xff] }
 0x218   :  { %1511 = vmatpush.msrb.mxu0 %v54_v23  ;;  %v84_v23 = vld [vmem:[%s4197_s6 + $0x138] sm:$0xff] }
 0x21a   :  { %1512 = vmatpush.msrb.mxu0 %v53_v38  ;;  %v100_v38 = vld [vmem:[%s4197_s6 + $0x1b8] sm:$0xff] }
 0x21c   :  { %1513 = vmatpush.msrb.mxu0 %v52_v37  ;;  %v67_v37 = vld [vmem:[%s4197_s6 + $0xb0] sm:$0xff] }
 0x21e   :  { %1514 = vmatpush.msrb.mxu0 %v51_v51  ;;  %v66_v51 = vld [vmem:[%s4197_s6 + $0xa8] sm:$0xff] }
 0x220   :  { %1515 = vmatpush.msrb.mxu0 %v50_v59  ;;  %v97_v59 = vld [vmem:[%s4197_s6 + $0x1a0] sm:$0xff] }
 0x222   :  { %1516 = vmatpush.msrb.mxu0 %v49_v45  ;;  %v79_v45 = vld [vmem:[%s4197_s6 + $0x110] sm:$0xff] }
 0x224   :  { %1517 = vmatpush.msrb.mxu0 %v48_v26  ;;  %v94_v26 = vld [vmem:[%s4197_s6 + $0x188] sm:$0xff] }
 0x284   :  { %v1368_v17 = vpop.f32.mrf.mxu2  ;;  %v1391_v58 = vpop.f32.mrf.mxu3 }
 0x285   :  { %v3412_v5 = vadd.f32 %v1368_v17, %v1291_v10  ;;  %v3414_v50 = vadd.f32 %v1391_v58, %v1291_v10 }
 0x287   :  { %v1399_v54 = vmax.f32 %v3412_v5, 0.0  ;;  %v1400_v44 = vmax.f32 %v3414_v50, 0.0 }
 0x288   :  { %v1322_v53 = vpop.f32.mrf.mxu0  ;;  %v1345_v25 = vpop.f32.mrf.mxu1 }
 0x289   :  { %v3416_v61 = vadd.f32 %v1322_v53, %v1291_v10  ;;  %v3418_v55 = vadd.f32 %v1345_v25, %v1291_v10 }
 0x28b   :  { %v1397_v52 = vmax.f32 %v3416_v61, 0.0  ;;  %v1398_v14 = vmax.f32 %v3418_v55, 0.0 }
 0x28c   :  { %v1394_v42 = vpop.f32.mrf.mxu3  ;;  %v1371_v9 = vpop.f32.mrf.mxu2 }
 0x28d   :  { %v2439_v30 = vpack.i.bf16 %v1399_v54, %v1397_v52  ;;  %v2444_v36 = vpack.i.bf16 %v1398_v14, %v1400_v44  ;;  %v3424_v6 = vadd.f32 %v1394_v42, %v1296_v47  ;;  %v3426_v15 = vadd.f32 %v1371_v9, %v1296_v47  ;;  %v47_v42 = vld [vmem:[%s4197_s6 + $0x10] sm:$0xff] }
 0x28e   :  { %v75_v9 = vld [vmem:[%s4197_s6 + $0xf0] sm:$0xff]  ;;  %1518 = vmatpush.msrb.mxu0 %v47_v42 }
 0x28f   :  { %2445 = vrot.lane.b32.xlu1 %v2444_v36, %s2543_s25  ;;  %2440 = vrot.lane.b32.xlu0 %v2439_v30, %s2543_s25  ;;  %v1404_v1 = vmax.f32 %v3424_v6, 0.0  ;;  %v1403_v34 = vmax.f32 %v3426_v15, 0.0  ;;  %v91_v30 = vld [vmem:[%s4197_s6 + $0x170] sm:$0xff]  ;;  %v46_v6 = vld [vmem:[%s4197_s6 + $0x8] sm:$0xff] }
 0x290   :  { %v1348_v12 = vpop.f32.mrf.mxu1  ;;  %v1325_v19 = vpop.f32.mrf.mxu0  ;;  %1529 = vmatpush.msrb.mxu1 %v75_v9  ;;  %v107_v36 = vld [vmem:[%s4197_s6 + $0x1f0] sm:$0xff]  ;;  %v74_v15 = vld [vmem:[%s4197_s6 + $0xe8] sm:$0xff]  ;;  %1552 = vmatpush.msrb.mxu2 %v91_v30 }
 0x291   :  { %v3430_v35 = vadd.f32 %v1348_v12, %v1296_v47  ;;  %v3433_v20 = vadd.f32 %v1325_v19, %v1296_v47  ;;  %1575 = vmatpush.msrb.mxu3 %v107_v36  ;;  %v90_v12 = vld [vmem:[%s4197_s6 + $0x168] sm:$0xff]  ;;  %1519 = vmatpush.msrb.mxu0 %v46_v6 }
 0x292   :  { %v106_v19 = vld [vmem:[%s4197_s6 + $0x1e8] sm:$0xff]  ;;  %1530 = vmatpush.msrb.mxu1 %v74_v15  ;;  %1553 = vmatpush.msrb.mxu2 %v90_v12 }
 0x293   :  { %v1402_v46 = vmax.f32 %v3430_v35, 0.0  ;;  %v1401_v60 = vmax.f32 %v3433_v20, 0.0  ;;  %v45_v35 = vld [vmem:[%s4197_s6] sm:$0xff]  ;;  %1576 = vmatpush.msrb.mxu3 %v106_v19 }
 0x294   :  { %v89_v20 = vld [vmem:[%s4197_s6 + $0x160] sm:$0xff]  ;;  %1520 = vmatpush.msrb.mxu0 %v45_v35 }
 0x295   :  { %v2454_v18 = vpack.i.bf16 %v1402_v46, %v1404_v1  ;;  %v2449_v49 = vpack.i.bf16 %v1403_v34, %v1401_v60  ;;  %1554 = vmatpush.msrb.mxu2 %v89_v20 }
 0x297   :  { %2455 = vrot.lane.b32.xlu0 %v2454_v18, %s2543_s25  ;;  %2450 = vrot.lane.b32.xlu2 %v2449_v49, %s2543_s25  ;;  %v104_v18 = vld [vmem:[%s4197_s6 + $0x1d8] sm:$0xff]  ;;  %v71_v49 = vld [vmem:[%s4197_s6 + $0xd0] sm:$0xff] }
 0x2f1   :  { %v2451_v56 = vpop.permute.xlu2 %2450 }
 0x2f2   :  { %v2453_v10 = vunpack.i.h.bf16 %v2451_v56  ;;  %v2452_v17 = vunpack.i.l.bf16 %v2451_v56  ;;  %v95_v56 = vld [vmem:[%s4197_s6 + $0x190] sm:$0xff] }
 0x301   :  { %v2446_v39 = vpop.permute.xlu1 %2445  ;;  %v2441_v31 = vpop.permute.xlu0 %2440 }
 0x302   :  { %v2448_v41 = vunpack.i.h.bf16 %v2446_v39  ;;  %v2447_v62 = vunpack.i.l.bf16 %v2446_v39  ;;  %v2443_v13 = vunpack.i.h.bf16 %v2441_v31  ;;  %v2442_v24 = vunpack.i.l.bf16 %v2441_v31  ;;  %v83_v39 = vld [vmem:[%s4197_s6 + $0x130] sm:$0xff] }
 0x303   :  { %v99_v31 = vld [vmem:[%s4197_s6 + $0x1b0] sm:$0xff] }
 0x304   :  { %v1430_v3 = vsel %vm1224_vm14, %v2448_v41, %v2443_v13  ;;  %v1431_v16 = vsel %vm1224_vm14, %v2443_v13, %v2447_v62  ;;  %v1429_v27 = vsel %vm1224_vm14, %v2442_v24, %v2448_v41  ;;  %v1445_v28 = vsel %vm1224_vm14, %v2447_v62, %v2442_v24  ;;  %v82_v41 = vld [vmem:[%s4197_s6 + $0x128] sm:$0xff]  ;;  %v65_v13 = vld [vmem:[%s4197_s6 + $0xa0] sm:$0xff] }
 0x305   :  { %v3494_v4 = vmax.f32 %v1399_v54, %v1431_v16  ;;  %v3496_v8 = vmax.f32 %v1400_v44, %v1445_v28  ;;  %v3498_v43 = vmax.f32 %v1397_v52, %v1429_v27  ;;  %v3500_v29 = vmax.f32 %v1398_v14, %v1430_v3  ;;  %v98_v62 = vld [vmem:[%s4197_s6 + $0x1a8] sm:$0xff]  ;;  %v81_v24 = vld [vmem:[%s4197_s6 + $0x120] sm:$0xff]  ;;  %v64_v3 = vld [vmem:[%s4197_s6 + $0x98] sm:$0xff] }
 0x306   :  { %v80_v16 = vld [vmem:[%s4197_s6 + $0x118] sm:$0xff]  ;;  %v63_v28 = vld [vmem:[%s4197_s6 + $0x90] sm:$0xff] }
 0x307   :  { %v2459_v63 = vpack.i.bf16 %v3496_v8, %v3494_v4  ;;  %v2464_v2 = vpack.i.bf16 %v3500_v29, %v3498_v43  ;;  %v96_v27 = vld [vmem:[%s4197_s6 + $0x198] sm:$0xff] }
 0x309   :  { %v2456_v11 = vpop.permute.xlu0 %2455  ;;  %2460 = vrot.lane.b32.xlu1 %v2459_v63, %s2542_s24  ;;  %2465 = vrot.lane.b32.xlu2 %v2464_v2, %s2542_s24  ;;  %v62_v63 = vld [vmem:[%s4197_s6 + $0x88] sm:$0xff] }
 0x30a   :  { %v2458_v58 = vunpack.i.h.bf16 %v2456_v11  ;;  %v2457_v5 = vunpack.i.l.bf16 %v2456_v11  ;;  %v78_v2 = vld [vmem:[%s4197_s6 + $0x108] sm:$0xff]  ;;  %v61_v11 = vld [vmem:[%s4197_s6 + $0x80] sm:$0xff] }
 0x30c   :  { %v1432_v50 = vsel %vm1224_vm14, %v2452_v17, %v2458_v58  ;;  %v1433_v53 = vsel %vm1224_vm14, %v2458_v58, %v2453_v10  ;;  %v1434_v25 = vsel %vm1224_vm14, %v2453_v10, %v2457_v5  ;;  %v1446_v61 = vsel %vm1224_vm14, %v2457_v5, %v2452_v17  ;;  %v77_v10 = vld [vmem:[%s4197_s6 + $0x100] sm:$0xff] }
 0x30d   :  { %v3520_v55 = vmax.f32 %v1403_v34, %v1434_v25  ;;  %v3524_v54 = vmax.f32 %v1404_v1, %v1446_v61  ;;  %v3528_v44 = vmax.f32 %v1401_v60, %v1432_v50  ;;  %v3532_v47 = vmax.f32 %v1402_v46, %v1433_v53  ;;  %v73_v1 = vld [vmem:[%s4197_s6 + $0xe0] sm:$0xff]  ;;  %v72_v46 = vld [vmem:[%s4197_s6 + $0xd8] sm:$0xff] }
 0x30e   :  { %v105_v34 = vld [vmem:[%s4197_s6 + $0x1e0] sm:$0xff]  ;;  %1531 = vmatpush.msrb.mxu1 %v73_v1  ;;  %v88_v60 = vld [vmem:[%s4197_s6 + $0x158] sm:$0xff] }
 0x30f   :  { %v2469_v52 = vpack.i.bf16 %v3524_v54, %v3520_v55  ;;  %v2474_v14 = vpack.i.bf16 %v3532_v47, %v3528_v44  ;;  %1577 = vmatpush.msrb.mxu3 %v105_v34  ;;  %1555 = vmatpush.msrb.mxu2 %v88_v60  ;;  %v93_v17 = vld [vmem:[%s4197_s6 + $0x180] sm:$0xff]  ;;  %s2545_s6 = smov 79  }
 0x310   :  { %1532 = vmatpush.msrb.mxu1 %v72_v46 }
 0x311   :  { %2470 = vrot.lane.b32.xlu0 %v2469_v52, %s2542_s24  ;;  %2475 = vrot.lane.b32.xlu1 %v2474_v14, %s2542_s24  ;;  %s2158_s24 = sshll.u32 %s4201_s10, 4  ;;  %s2159_s24 = int_to_ptr.hbm [resolvable:$true] %s2158_s24 }
 0x312   :  { %1578 = vmatpush.msrb.mxu3 %v104_v18  ;;  %1533 = vmatpush.msrb.mxu1 %v71_v49 }
 0x313   :  { %1556 = vmatpush.msrb.mxu2 %v87_v32 }
 0x314   :  { %1579 = vmatpush.msrb.mxu3 %v103_v33  ;;  %1534 = vmatpush.msrb.mxu1 %v70_v57 }
 0x315   :  { %1557 = vmatpush.msrb.mxu2 %v86_v21 }
 0x316   :  { %1580 = vmatpush.msrb.mxu3 %v102_v7  ;;  %1535 = vmatpush.msrb.mxu1 %v69_v22 }
 0x317   :  { %1558 = vmatpush.msrb.mxu2 %v85_v40 }
 0x318   :  { %1581 = vmatpush.msrb.mxu3 %v101_v48  ;;  %1536 = vmatpush.msrb.mxu1 %v68_v0 }
 0x319   :  { %1559 = vmatpush.msrb.mxu2 %v84_v23 }
 0x31a   :  { %1582 = vmatpush.msrb.mxu3 %v100_v38  ;;  %1537 = vmatpush.msrb.mxu1 %v67_v37 }
 0x31b   :  { %1560 = vmatpush.msrb.mxu2 %v83_v39 }
 0x31c   :  { %1583 = vmatpush.msrb.mxu3 %v99_v31  ;;  %1538 = vmatpush.msrb.mxu1 %v66_v51  ;;  %v129_v31 = vld [vmem:[%s4198_s7 + $0xa0] sm:$0x1]  ;;  %v128_v51 = vld [vmem:[%s4198_s7 + $0x98] sm:$0xff] }
 0x31d   :  { %1561 = vmatpush.msrb.mxu2 %v82_v41 }
 0x31e   :  { %1584 = vmatpush.msrb.mxu3 %v98_v62  ;;  %1539 = vmatpush.msrb.mxu1 %v65_v13  ;;  %v115_v62 = vld [vmem:[%s4198_s7 + $0x30] sm:$0x1] }
 0x31f   :  { %1562 = vmatpush.msrb.mxu2 %v81_v24  ;;  %v127_v24 = vld [vmem:[%s4198_s7 + $0x90] sm:$0xff] }
 0x320   :  { %1585 = vmatpush.msrb.mxu3 %v97_v59  ;;  %1540 = vmatpush.msrb.mxu1 %v64_v3  ;;  %v114_v59 = vld [vmem:[%s4198_s7 + $0x28] sm:$0xff] }
 0x321   :  { %1563 = vmatpush.msrb.mxu2 %v80_v16  ;;  %v126_v16 = vld [vmem:[%s4198_s7 + $0x88] sm:$0xff] }
 0x322   :  { %1586 = vmatpush.msrb.mxu3 %v96_v27  ;;  %1541 = vmatpush.msrb.mxu1 %v63_v28 }
 0x323   :  { %1564 = vmatpush.msrb.mxu2 %v79_v45  ;;  %v125_v45 = vld [vmem:[%s4198_s7 + $0x80] sm:$0xff] }
 0x324   :  { %1587 = vmatpush.msrb.mxu3 %v95_v56  ;;  %1542 = vmatpush.msrb.mxu1 %v62_v63  ;;  %v124_v56 = vld [vmem:[%s4198_s7 + $0x78] sm:$0xff] }
 0x325   :  { %1565 = vmatpush.msrb.mxu2 %v78_v2 }
 0x326   :  { %1588 = vmatpush.msrb.mxu3 %v94_v26  ;;  %1543 = vmatpush.msrb.mxu1 %v61_v11 }
 0x327   :  { %1566 = vmatpush.msrb.mxu2 %v77_v10 }
 0x328   :  { %1589 = vmatpush.msrb.mxu3 %v93_v17  ;;  %2214 = vmatpush.msk.msra.mxu1 %vm421_vm0, %v115_v62  ;;  %v160_v62 = vld [vmem:[%s4198_s7 + $0x198] sm:$0xff] }
 0x329   :  { %2216 = vmatpush.msk.msra.mxu2 %vm421_vm0, %v129_v31  ;;  %v161_v31 = vld [vmem:[%s4198_s7 + $0x1a0] sm:$0xff] }
 0x32a   :  { %1652 = vmatpush.msra.mxu1 %v114_v59  ;;  %v145_v59 = vld [vmem:[%s4198_s7 + $0x120] sm:$0xff] }
 0x32b   :  { %1684 = vmatpush.msra.mxu2 %v128_v51  ;;  %v138_v51 = vld [vmem:[%s4198_s7 + $0xe8] sm:$0xff] }
 0x32d   :  { %1685 = vmatpush.msra.mxu2 %v127_v24  ;;  %v137_v24 = vld [vmem:[%s4198_s7 + $0xe0] sm:$0xff] }
 0x32f   :  { %1686 = vmatpush.msra.mxu2 %v126_v16  ;;  %v159_v16 = vld [vmem:[%s4198_s7 + $0x190] sm:$0xff] }
 0x331   :  { %1687 = vmatpush.msra.mxu2 %v125_v45  ;;  %v144_v45 = vld [vmem:[%s4198_s7 + $0x118] sm:$0xff] }
 0x333   :  { %1688 = vmatpush.msra.mxu2 %v124_v56  ;;  %v158_v56 = vld [vmem:[%s4198_s7 + $0x188] sm:$0xff] }
 0x363   :  { %v2466_v58 = vpop.permute.xlu2 %2465 }
 0x364   :  { %v2468_v5 = vunpack.i.h.bf16 %v2466_v58  ;;  %v2467_v50 = vunpack.i.l.bf16 %v2466_v58  ;;  %v113_v58 = vld [vmem:[%s4198_s7 + $0x20] sm:$0xff] }
 0x365   :  { %1653 = vmatpush.msra.mxu1 %v113_v58 }
 0x366   :  { %v1479_v53 = vsel %vm1260_vm12, %v2467_v50, %v2468_v5 }
 0x367   :  { %v1497_v25 = vmax.f32 %v3498_v43, %v1479_v53  ;;  %v112_v53 = vld [vmem:[%s4198_s7 + $0x18] sm:$0xff] }
 0x368   :  { %1654 = vmatpush.msra.mxu1 %v112_v53  ;;  %v184_v53 = vld [vmem:[%s4198_s7 + $0x258] sm:$0xff] }
 0x369   :  { %1521 = vmatmul.f32.vlgmr.msrb.gmra.mxu0 %v1497_v25  ;;  %v121_v25 = vld [vmem:[%s4198_s7 + $0x60] sm:$0xff] }
 0x37b   :  { %v2461_v61 = vpop.permute.xlu1 %2460 }
 0x37c   :  { %v2463_v52 = vunpack.i.h.bf16 %v2461_v61  ;;  %v2462_v14 = vunpack.i.l.bf16 %v2461_v61  ;;  %v111_v61 = vld [vmem:[%s4198_s7 + $0x10] sm:$0xff] }
 0x37d   :  { %1655 = vmatpush.msra.mxu1 %v111_v61  ;;  %v182_v61 = vld [vmem:[%s4198_s7 + $0x248] sm:$0xff] }
 0x37e   :  { %v1480_v42 = vsel %vm1260_vm12, %v2468_v5, %v2462_v14  ;;  %v1481_v9 = vsel %vm1260_vm12, %v2462_v14, %v2463_v52  ;;  %v1495_v30 = vsel %vm1260_vm12, %v2463_v52, %v2467_v50  ;;  %v123_v5 = vld [vmem:[%s4198_s7 + $0x70] sm:$0xff]  ;;  %v122_v50 = vld [vmem:[%s4198_s7 + $0x68] sm:$0x1]  ;;  %v136_v52 = vld [vmem:[%s4198_s7 + $0xd8] sm:$0x1] }
 0x37f   :  { %v1498_v36 = vmax.f32 %v3500_v29, %v1480_v42  ;;  %v1499_v6 = vmax.f32 %v3494_v4, %v1481_v9  ;;  %v1500_v15 = vmax.f32 %v3496_v8, %v1495_v30  ;;  %1689 = vmatpush.msra.mxu2 %v123_v5  ;;  %2212 = vmatpush.msk.msra.mxu0 %vm421_vm0, %v122_v50  ;;  %v120_v14 = vld [vmem:[%s4198_s7 + $0x58] sm:$0xff]  ;;  %v135_v42 = vld [vmem:[%s4198_s7 + $0xd0] sm:$0xff]  ;;  %v110_v9 = vld [vmem:[%s4198_s7 + $0x8] sm:$0xff] }
 0x380   :  { %2218 = vmatpush.msk.msra.mxu3 %vm421_vm0, %v136_v52  ;;  %1656 = vmatpush.msra.mxu1 %v110_v9  ;;  %v119_v30 = vld [vmem:[%s4198_s7 + $0x50] sm:$0xff]  ;;  %v185_v5 = vld [vmem:[%s4198_s7 + $0x260] sm:$0x1]  ;;  %v178_v52 = vld [vmem:[%s4198_s7 + $0x228] sm:$0x1] }
 0x381   :  { %1544 = vmatmul.f32.vlgmr.msrb.gmra.mxu1 %v1498_v36  ;;  %1567 = vmatmul.f32.vlgmr.msrb.gmra.mxu2 %v1499_v6  ;;  %v109_v36 = vld [vmem:[%s4198_s7] sm:$0xff]  ;;  %v134_v6 = vld [vmem:[%s4198_s7 + $0xc8] sm:$0xff] }
 0x382   :  { %1590 = vmatmul.f32.vlgmr.msrb.gmra.mxu3 %v1500_v15  ;;  %1626 = vmatpush.msra.mxu0 %v121_v25  ;;  %v118_v15 = vld [vmem:[%s4198_s7 + $0x48] sm:$0xff]  ;;  %v183_v25 = vld [vmem:[%s4198_s7 + $0x250] sm:$0xff]  ;;  %v177_v9 = vld [vmem:[%s4198_s7 + $0x220] sm:$0xff] }
 0x383   :  { %v2471_v43 = vpop.permute.xlu0 %2470  ;;  %v2476_v12 = vpop.permute.xlu1 %2475  ;;  %1717 = vmatpush.msra.mxu3 %v135_v42  ;;  %1657 = vmatpush.msra.mxu1 %v109_v36  ;;  %v176_v36 = vld [vmem:[%s4198_s7 + $0x218] sm:$0xff] }
 0x384   :  { %v2473_v19 = vunpack.i.h.bf16 %v2471_v43  ;;  %v2472_v35 = vunpack.i.l.bf16 %v2471_v43  ;;  %v2478_v1 = vunpack.i.h.bf16 %v2476_v12  ;;  %v2477_v20 = vunpack.i.l.bf16 %v2476_v12  ;;  %1627 = vmatpush.msra.mxu0 %v120_v14  ;;  %v157_v43 = vld [vmem:[%s4198_s7 + $0x180] sm:$0x1] }
 0x385   :  { %1718 = vmatpush.msra.mxu3 %v134_v6  ;;  %2224 = vmatpush.msk.msrb.mxu2 %vm421_vm0, %v157_v43  ;;  %v133_v12 = vld [vmem:[%s4198_s7 + $0xc0] sm:$0xff]  ;;  %v179_v6 = vld [vmem:[%s4198_s7 + $0x230] sm:$0xff]  ;;  %v174_v43 = vld [vmem:[%s4198_s7 + $0x208] sm:$0xff] }
 0x386   :  { %v1482_v34 = vsel %vm1260_vm12, %v2477_v20, %v2478_v1  ;;  %v1483_v46 = vsel %vm1260_vm12, %v2478_v1, %v2472_v35  ;;  %v1484_v60 = vsel %vm1260_vm12, %v2472_v35, %v2473_v19  ;;  %v1496_v29 = vsel %vm1260_vm12, %v2473_v19, %v2477_v20  ;;  %1628 = vmatpush.msra.mxu0 %v119_v30  ;;  %v117_v19 = vld [vmem:[%s4198_s7 + $0x40] sm:$0xff]  ;;  %v156_v35 = vld [vmem:[%s4198_s7 + $0x178] sm:$0xff]  ;;  %v155_v20 = vld [vmem:[%s4198_s7 + $0x170] sm:$0xff] }
 0x387   :  { %v1501_v4 = vmax.f32 %v3528_v44, %v1482_v34  ;;  %v1502_v8 = vmax.f32 %v3532_v47, %v1483_v46  ;;  %v1503_v18 = vmax.f32 %v3520_v55, %v1484_v60  ;;  %v1504_v49 = vmax.f32 %v3524_v54, %v1496_v29  ;;  %v132_v1 = vld [vmem:[%s4198_s7 + $0xb8] sm:$0xff]  ;;  %1719 = vmatpush.msra.mxu3 %v133_v12  ;;  %v131_v46 = vld [vmem:[%s4198_s7 + $0xb0] sm:$0xff]  ;;  %v154_v29 = vld [vmem:[%s4198_s7 + $0x168] sm:$0xff] }
 0x388   :  { %1629 = vmatpush.msra.mxu0 %v118_v15  ;;  %1816 = vmatpush.msrb.mxu2 %v156_v35  ;;  %v116_v34 = vld [vmem:[%s4198_s7 + $0x38] sm:$0xff]  ;;  %v143_v60 = vld [vmem:[%s4198_s7 + $0x110] sm:$0x1]  ;;  %v181_v14 = vld [vmem:[%s4198_s7 + $0x240] sm:$0xff] }
 0x389   :  { %1524 = vmatmul.f32.gmra.mxu0 %v1501_v4  ;;  %1547 = vmatmul.f32.gmra.mxu1 %v1502_v8  ;;  %v130_v4 = vld [vmem:[%s4198_s7 + $0xa8] sm:$0xff]  ;;  %v180_v30 = vld [vmem:[%s4198_s7 + $0x238] sm:$0xff]  ;;  %v175_v15 = vld [vmem:[%s4198_s7 + $0x210] sm:$0xff] }
 0x38a   :  { %1570 = vmatmul.f32.gmra.mxu2 %v1503_v18  ;;  %1593 = vmatmul.f32.gmra.mxu3 %v1504_v49  ;;  %v142_v8 = vld [vmem:[%s4198_s7 + $0x108] sm:$0xff]  ;;  %v153_v49 = vld [vmem:[%s4198_s7 + $0x160] sm:$0xff] }
 0x38b   :  { %1630 = vmatpush.msra.mxu0 %v117_v19  ;;  %1720 = vmatpush.msra.mxu3 %v132_v1  ;;  %v150_v18 = vld [vmem:[%s4198_s7 + $0x148] sm:$0x1]  ;;  %v173_v12 = vld [vmem:[%s4198_s7 + $0x200] sm:$0xff]  ;;  %v172_v19 = vld [vmem:[%s4198_s7 + $0x1f8] sm:$0xff] }
 0x38c   :  { %1817 = vmatpush.msrb.mxu2 %v155_v20  ;;  %2222 = vmatpush.msk.msrb.mxu1 %vm421_vm0, %v150_v18  ;;  %v171_v1 = vld [vmem:[%s4198_s7 + $0x1f0] sm:$0x1]  ;;  %v168_v18 = vld [vmem:[%s4198_s7 + $0x1d8] sm:$0xff] }
 0x38d   :  { %1631 = vmatpush.msra.mxu0 %v116_v34  ;;  %1721 = vmatpush.msra.mxu3 %v131_v46 }
 0x38e   :  { %1818 = vmatpush.msrb.mxu2 %v154_v29  ;;  %v192_v29 = vld [vmem:[%s4198_s7 + $0x298] sm:$0x1] }
 0x38f   :  { %2220 = vmatpush.msk.msrb.mxu0 %vm421_vm0, %v143_v60  ;;  %1722 = vmatpush.msra.mxu3 %v130_v4  ;;  %v170_v60 = vld [vmem:[%s4198_s7 + $0x1e8] sm:$0xff] }
 0x390   :  { %1819 = vmatpush.msrb.mxu2 %v153_v49 }
 0x391   :  { %1750 = vmatpush.msrb.mxu0 %v142_v8  ;;  %v191_v8 = vld [vmem:[%s4198_s7 + $0x290] sm:$0xff] }
 0x3e6   :  { %v1522_v33 = vpop.f32.mrf.mxu0 }
 0x3fe   :  { %v1545_v32 = vpop.f32.mrf.mxu1 }
 0x3ff   :  { %v1546_v57 = vadd.f32 %v1545_v32, %v1522_v33  ;;  %v164_v32 = vld [vmem:[%s4198_s7 + $0x1b8] sm:$0x1]  ;;  %v141_v33 = vld [vmem:[%s4198_s7 + $0x100] sm:$0xff] }
 0x400   :  { %2226 = vmatpush.msk.msrb.mxu3 %vm421_vm0, %v164_v32  ;;  %1751 = vmatpush.msrb.mxu0 %v141_v33  ;;  %v167_v32 = vld [vmem:[%s4198_s7 + $0x1d0] sm:$0xff]  ;;  %v213_v33 = vld [vmem:[%s4198_s7 + $0x340] sm:$0x1] }
 0x404   :  { %v1568_v21 = vpop.f32.mrf.mxu2 }
 0x405   :  { %v1569_v7 = vadd.f32 %v1568_v21, %v1546_v57  ;;  %v1591_v22 = vpop.f32.mrf.mxu3  ;;  %v149_v57 = vld [vmem:[%s4198_s7 + $0x140] sm:$0xff]  ;;  %v152_v21 = vld [vmem:[%s4198_s7 + $0x158] sm:$0xff] }
 0x406   :  { %v1525_v44 = vpop.f32.mrf.mxu0  ;;  %v1548_v47 = vpop.f32.mrf.mxu1  ;;  %1783 = vmatpush.msrb.mxu1 %v149_v57  ;;  %1820 = vmatpush.msrb.mxu2 %v152_v21 }
 0x407   :  { %v3700_v40 = vadd.f32 %v1591_v22, %v1569_v7  ;;  %v1549_v0 = vadd.f32 %v1548_v47, %v1525_v44  ;;  %v163_v7 = vld [vmem:[%s4198_s7 + $0x1b0] sm:$0xff]  ;;  %v140_v22 = vld [vmem:[%s4198_s7 + $0xf8] sm:$0xff] }
 0x408   :  { %1848 = vmatpush.msrb.mxu3 %v163_v7  ;;  %1752 = vmatpush.msrb.mxu0 %v140_v22  ;;  %v148_v44 = vld [vmem:[%s4198_s7 + $0x138] sm:$0xff]  ;;  %v151_v47 = vld [vmem:[%s4198_s7 + $0x150] sm:$0xff]  ;;  %v189_v7 = vld [vmem:[%s4198_s7 + $0x280] sm:$0xff] }
 0x409   :  { %1605 = vrot.lane.b32.xlu0 %v3700_v40, %s2545_s6  ;;  %v1662_v55 = vrot.slane %v3700_v40, 2  ;;  %v1603_v54 = vrot.slane %v3700_v40, 1  ;;  %v1761_v23 = vrot.slane %v3700_v40, 5  ;;  %v1695_v37 = vrot.slane %v3700_v40, 3  ;;  %1784 = vmatpush.msrb.mxu1 %v148_v44  ;;  %v166_v22 = vld [vmem:[%s4198_s7 + $0x1c8] sm:$0xff] }
 0x40a   :  { %v1598_v39 = vrot.slane %v3700_v40, 7  ;;  %v1728_v3 = vrot.slane %v3700_v40, 4  ;;  %v1794_v27 = vrot.slane %v3700_v40, 6  ;;  %1821 = vmatpush.msrb.mxu2 %v151_v47  ;;  %v212_v47 = vld [vmem:[%s4198_s7 + $0x338] sm:$0xff] }
 0x40b   :  { %1697 = vrot.lane.b32.xlu1 %v1662_v55, %s2545_s6  ;;  %1664 = vrot.lane.b32.xlu2 %v1603_v54, %s2545_s6 }
 0x40d   :  { %v1571_v48 = vpop.f32.mrf.mxu2  ;;  %v1594_v41 = vpop.f32.mrf.mxu3 }
 0x40e   :  { %v1572_v38 = vadd.f32 %v1571_v48, %v1549_v0  ;;  %v162_v48 = vld [vmem:[%s4198_s7 + $0x1a8] sm:$0xff]  ;;  %v139_v0 = vld [vmem:[%s4198_s7 + $0xf0] sm:$0xff] }
 0x40f   :  { %1849 = vmatpush.msrb.mxu3 %v162_v48  ;;  %1753 = vmatpush.msrb.mxu0 %v139_v0  ;;  %v211_v0 = vld [vmem:[%s4198_s7 + $0x330] sm:$0xff] }
 0x410   :  { %v3734_v13 = vadd.f32 %v1594_v41, %v1572_v38  ;;  %v147_v38 = vld [vmem:[%s4198_s7 + $0x130] sm:$0xff]  ;;  %v146_v41 = vld [vmem:[%s4198_s7 + $0x128] sm:$0xff] }
 0x411   :  { %1796 = vrot.lane.b32.xlu0 %v1761_v23, %s2545_s6  ;;  %1785 = vmatpush.msrb.mxu1 %v147_v38  ;;  %v199_v38 = vld [vmem:[%s4198_s7 + $0x2d0] sm:$0x1] }
 0x412   :  { %v1892_v28 = vrot.slane %v3734_v13, 1  ;;  %v1925_v63 = vrot.slane %v3734_v13, 2  ;;  %v1860_v2 = vrot.slane %v3734_v13, 7  ;;  %v1958_v26 = vrot.slane %v3734_v13, 3  ;;  %1850 = vmatpush.msrb.mxu3 %v161_v31  ;;  %1754 = vmatpush.msrb.mxu0 %v138_v51  ;;  %v187_v31 = vld [vmem:[%s4198_s7 + $0x270] sm:$0xff]  ;;  %v210_v51 = vld [vmem:[%s4198_s7 + $0x328] sm:$0xff] }
 0x413   :  { %1730 = vrot.lane.b32.xlu1 %v1695_v37, %s2545_s6  ;;  %1599 = vrot.lane.b32.xlu2 %v1598_v39, %s2545_s6  ;;  %v2057_v11 = vrot.slane %v3734_v13, 6  ;;  %v2024_v10 = vrot.slane %v3734_v13, 5  ;;  %v1991_v17 = vrot.slane %v3734_v13, 4 }
 0x414   :  { %1786 = vmatpush.msrb.mxu1 %v146_v41  ;;  %1851 = vmatpush.msrb.mxu3 %v160_v62  ;;  %v186_v62 = vld [vmem:[%s4198_s7 + $0x268] sm:$0xff] }
 0x415   :  { %1755 = vmatpush.msrb.mxu0 %v137_v24  ;;  %v198_v24 = vld [vmem:[%s4198_s7 + $0x2c8] sm:$0xff] }
 0x416   :  { %1787 = vmatpush.msrb.mxu1 %v145_v59  ;;  %1852 = vmatpush.msrb.mxu3 %v159_v16 }
 0x418   :  { %1788 = vmatpush.msrb.mxu1 %v144_v45  ;;  %1853 = vmatpush.msrb.mxu3 %v158_v56  ;;  %v206_v45 = vld [vmem:[%s4198_s7 + $0x308] sm:$0x1]  ;;  %v209_v56 = vld [vmem:[%s4198_s7 + $0x320] sm:$0xff] }
 0x419   :  { %1763 = vrot.lane.b32.xlu0 %v1728_v3, %s2545_s6 }
 0x41b   :  { %1828 = vrot.lane.b32.xlu2 %v1794_v27, %s2545_s6  ;;  %1927 = vrot.lane.b32.xlu1 %v1892_v28, %s2545_s6 }
 0x421   :  { %1960 = vrot.lane.b32.xlu0 %v1925_v63, %s2545_s6 }
 0x423   :  { %1894 = vrot.lane.b32.xlu1 %v3734_v13, %s2545_s6  ;;  %1861 = vrot.lane.b32.xlu2 %v1860_v2, %s2545_s6 }
 0x429   :  { %1993 = vrot.lane.b32.xlu0 %v1958_v26, %s2545_s6 }
 0x42b   :  { %2091 = vrot.lane.b32.xlu1 %v2057_v11, %s2545_s6  ;;  %2059 = vrot.lane.b32.xlu2 %v2024_v10, %s2545_s6 }
 0x433   :  { %2026 = vrot.lane.b32.xlu2 %v1991_v17, %s2545_s6 }
 0x465   :  { %v1665_v58 = vpop.permute.xlu2 %1664 }
 0x466   :  { %v1667_v50 = vsel %vm421_vm0, %v1662_v55, %v1665_v58 }
 0x467   :  { %2217 = vmatmul.msk.f32.vlgmr.msra.gmra.mxu2 %vm1609_vm1, %v1667_v50  ;;  %v205_v50 = vld [vmem:[%s4198_s7 + $0x300] sm:$0xff] }
 0x468   :  { %2232 = vmatpush.msk.msra.mxu2 %vm421_vm0, %v185_v5  ;;  %v197_v5 = vld [vmem:[%s4198_s7 + $0x2c0] sm:$0xff] }
 0x46a   :  { %1947 = vmatpush.msra.mxu2 %v184_v53  ;;  %v219_v53 = vld [vmem:[%s4198_s7 + $0x370] sm:$0xff] }
 0x46c   :  { %1948 = vmatpush.msra.mxu2 %v183_v25  ;;  %v196_v25 = vld [vmem:[%s4198_s7 + $0x2b8] sm:$0xff] }
 0x46d   :  { %v1600_v55 = vpop.permute.xlu2 %1599 }
 0x46e   :  { %v1602_v42 = vsel %vm421_vm0, %v3700_v40, %v1600_v55  ;;  %1949 = vmatpush.msra.mxu2 %v182_v61  ;;  %v204_v55 = vld [vmem:[%s4198_s7 + $0x2f8] sm:$0xff] }
 0x46f   :  { %2215 = vmatmul.msk.f32.vlgmr.msra.gmra.mxu1 %vm1609_vm1, %v1602_v42 }
 0x470   :  { %2230 = vmatpush.msk.msra.mxu1 %vm421_vm0, %v178_v52  ;;  %1950 = vmatpush.msra.mxu2 %v181_v14  ;;  %v207_v52 = vld [vmem:[%s4198_s7 + $0x310] sm:$0xff] }
 0x471   :  { %v195_v14 = vld [vmem:[%s4198_s7 + $0x2b0] sm:$0xff] }
 0x472   :  { %1914 = vmatpush.msra.mxu1 %v177_v9  ;;  %1951 = vmatpush.msra.mxu2 %v180_v30  ;;  %v218_v9 = vld [vmem:[%s4198_s7 + $0x368] sm:$0xff]  ;;  %v203_v30 = vld [vmem:[%s4198_s7 + $0x2f0] sm:$0xff] }
 0x474   :  { %1915 = vmatpush.msra.mxu1 %v176_v36  ;;  %1952 = vmatpush.msra.mxu2 %v179_v6 }
 0x475   :  { %v1829_v34 = vpop.permute.xlu2 %1828 }
 0x476   :  { %1916 = vmatpush.msra.mxu1 %v175_v15  ;;  %v1831_v44 = vsel %vm421_vm0, %v1598_v39, %v1829_v34  ;;  %v188_v39 = vld [vmem:[%s4198_s7 + $0x278] sm:$0xff]  ;;  %v217_v15 = vld [vmem:[%s4198_s7 + $0x360] sm:$0xff] }
 0x478   :  { %1917 = vmatpush.msra.mxu1 %v174_v43  ;;  %v194_v43 = vld [vmem:[%s4198_s7 + $0x2a8] sm:$0xff] }
 0x47a   :  { %1918 = vmatpush.msra.mxu1 %v173_v12 }
 0x47b   :  { %v1606_v35 = vpop.permute.xlu0 %1605 }
 0x47c   :  { %v1608_v20 = vsel %vm421_vm0, %v1603_v54, %v1606_v35  ;;  %1919 = vmatpush.msra.mxu1 %v172_v19  ;;  %v169_v54 = vld [vmem:[%s4198_s7 + $0x1e0] sm:$0xff]  ;;  %v202_v19 = vld [vmem:[%s4198_s7 + $0x2e8] sm:$0xff]  ;;  %v216_v35 = vld [vmem:[%s4198_s7 + $0x358] sm:$0xff] }
 0x47d   :  { %v1698_v46 = vpop.permute.xlu1 %1697  ;;  %2213 = vmatmul.msk.f32.vlgmr.msra.gmra.mxu0 %vm1609_vm1, %v1608_v20  ;;  %v1862_v48 = vpop.permute.xlu2 %1861  ;;  %v200_v20 = vld [vmem:[%s4198_s7 + $0x2d8] sm:$0xff] }
 0x47e   :  { %v1700_v4 = vsel %vm421_vm0, %v1695_v37, %v1698_v46  ;;  %2228 = vmatpush.msk.msra.mxu0 %vm421_vm0, %v171_v1  ;;  %v190_v37 = vld [vmem:[%s4198_s7 + $0x288] sm:$0xff]  ;;  %v1864_v58 = vsel %vm421_vm0, %v3734_v13, %v1862_v48  ;;  %v215_v1 = vld [vmem:[%s4198_s7 + $0x350] sm:$0xff] }
 0x47f   :  { %2219 = vmatmul.msk.f32.vlgmr.msra.gmra.mxu3 %vm1609_vm1, %v1700_v4 }
 0x480   :  { %1881 = vmatpush.msra.mxu0 %v170_v60  ;;  %2234 = vmatpush.msk.msra.mxu3 %vm421_vm0, %v192_v29  ;;  %v214_v60 = vld [vmem:[%s4198_s7 + $0x348] sm:$0xff] }
 0x482   :  { %1882 = vmatpush.msra.mxu0 %v169_v54  ;;  %1980 = vmatpush.msra.mxu3 %v191_v8 }
 0x483   :  { %v1797_v49 = vpop.permute.xlu0 %1796 }
 0x484   :  { %v1799_v57 = vsel %vm421_vm0, %v1794_v27, %v1797_v49  ;;  %1883 = vmatpush.msra.mxu0 %v168_v18  ;;  %1981 = vmatpush.msra.mxu3 %v190_v37 }
 0x485   :  { %v1731_v21 = vpop.permute.xlu1 %1730  ;;  %2225 = vmatmul.msk.f32.vlgmr.msrb.gmra.mxu2 %vm1609_vm1, %v1799_v57  ;;  %v2060_v61 = vpop.permute.xlu2 %2059 }
 0x486   :  { %v1733_v27 = vsel %vm421_vm0, %v1728_v3, %v1731_v21  ;;  %1884 = vmatpush.msra.mxu0 %v167_v32  ;;  %2240 = vmatpush.msk.msrb.mxu2 %vm421_vm0, %v213_v33  ;;  %v165_v3 = vld [vmem:[%s4198_s7 + $0x1c0] sm:$0xff]  ;;  %v2062_v12 = vsel %vm421_vm0, %v2057_v11, %v2060_v61 }
 0x487   :  { %2221 = vmatmul.msk.f32.vlgmr.msrb.gmra.mxu0 %vm1609_vm1, %v1733_v27  ;;  %2227 = vmatmul.msk.f32.vlgmr.msrb.gmra.mxu3 %vm1609_vm1, %v1831_v44  ;;  %v193_v11 = vld [vmem:[%s4198_s7 + $0x2a0] sm:$0xff] }
 0x488   :  { %1982 = vmatpush.msra.mxu3 %v189_v7  ;;  %1885 = vmatpush.msra.mxu0 %v166_v22 }
 0x489   :  { %2079 = vmatpush.msrb.mxu2 %v212_v47 }
 0x48a   :  { %1983 = vmatpush.msra.mxu3 %v188_v39  ;;  %1886 = vmatpush.msra.mxu0 %v165_v3 }
 0x48b   :  { %v1764_v41 = vpop.permute.xlu0 %1763  ;;  %2080 = vmatpush.msrb.mxu2 %v211_v0 }
 0x48c   :  { %2236 = vmatpush.msk.msrb.mxu0 %vm421_vm0, %v199_v38  ;;  %v1766_v59 = vsel %vm421_vm0, %v1761_v23, %v1764_v41  ;;  %1984 = vmatpush.msra.mxu3 %v187_v31  ;;  %v220_v23 = vld [vmem:[%s4198_s7 + $0x378] sm:$0x1] }
 0x48d   :  { %2223 = vmatmul.msk.f32.vlgmr.msrb.gmra.mxu1 %vm1609_vm1, %v1766_v59  ;;  %v1928_v16 = vpop.permute.xlu1 %1927  ;;  %2081 = vmatpush.msrb.mxu2 %v210_v51  ;;  %v2027_v34 = vpop.permute.xlu2 %2026 }
 0x48e   :  { %v1930_v40 = vsel %vm421_vm0, %v1925_v63, %v1928_v16  ;;  %1985 = vmatpush.msra.mxu3 %v186_v62  ;;  %2013 = vmatpush.msrb.mxu0 %v198_v24  ;;  %v208_v63 = vld [vmem:[%s4198_s7 + $0x318] sm:$0xff]  ;;  %v2029_v54 = vsel %vm421_vm0, %v2024_v10, %v2027_v34 }
 0x48f   :  { %2229 = vmatmul.msk.f32.vlgmr.msra.gmra.mxu0 %vm1609_vm1, %v1864_v58  ;;  %2233 = vmatmul.msk.f32.vlgmr.msra.gmra.mxu2 %vm1609_vm1, %v1930_v40 }
 0x490   :  { %2238 = vmatpush.msk.msrb.mxu1 %vm421_vm0, %v206_v45  ;;  %2082 = vmatpush.msrb.mxu2 %v209_v56  ;;  %v2479_v56 = vld [vmem:[%s4199_s8] ss:$0 sm:$0xff]  ;;  %s2547_s8 = smov [#allocation4]  }
 0x491   :  { %2242 = vmatpush.msk.msrb.mxu3 %vm421_vm0, %v220_v23  ;;  %2014 = vmatpush.msrb.mxu0 %v197_v5  ;;  %s2156_s1 = sshll.u32 %s2547_s8, 4  ;;  %s2157_s1 = int_to_ptr.vmem [resolvable:$true] %s2156_s1 }
 0x492   :  { %2046 = vmatpush.msrb.mxu1 %v205_v50  ;;  %2083 = vmatpush.msrb.mxu2 %v208_v63 }
 0x493   :  { %v1961_v42 = vpop.permute.xlu0 %1960  ;;  %2111 = vmatpush.msrb.mxu3 %v219_v53  ;;  %2015 = vmatpush.msrb.mxu0 %v196_v25 }
 0x494   :  { %v1963_v36 = vsel %vm421_vm0, %v1958_v26, %v1961_v42  ;;  %2047 = vmatpush.msrb.mxu1 %v204_v55  ;;  %2084 = vmatpush.msrb.mxu2 %v207_v52 }
 0x495   :  { %2235 = vmatmul.msk.f32.vlgmr.msra.gmra.mxu3 %vm1609_vm1, %v1963_v36  ;;  %v1895_v6 = vpop.permute.xlu1 %1894  ;;  %2016 = vmatpush.msrb.mxu0 %v195_v14 }
 0x496   :  { %v1897_v26 = vsel %vm421_vm0, %v1892_v28, %v1895_v6  ;;  %2112 = vmatpush.msrb.mxu3 %v218_v9  ;;  %2048 = vmatpush.msrb.mxu1 %v203_v30  ;;  %v201_v28 = vld [vmem:[%s4198_s7 + $0x2e0] sm:$0xff] }
 0x497   :  { %2231 = vmatmul.msk.f32.vlgmr.msra.gmra.mxu1 %vm1609_vm1, %v1897_v26  ;;  %2241 = vmatmul.msk.f32.vlgmr.msrb.gmra.mxu2 %vm1609_vm1, %v2062_v12 }
 0x498   :  { %2113 = vmatpush.msrb.mxu3 %v217_v15  ;;  %2017 = vmatpush.msrb.mxu0 %v194_v43 }
 0x499   :  { %2049 = vmatpush.msrb.mxu1 %v202_v19 }
 0x49a   :  { %2114 = vmatpush.msrb.mxu3 %v216_v35  ;;  %2018 = vmatpush.msrb.mxu0 %v193_v11 }
 0x49b   :  { %v1994_v46 = vpop.permute.xlu0 %1993  ;;  %2050 = vmatpush.msrb.mxu1 %v201_v28 }
 0x49c   :  { %v1996_v29 = vsel %vm421_vm0, %v1991_v17, %v1994_v46  ;;  %2115 = vmatpush.msrb.mxu3 %v215_v1 }
 0x49d   :  { %v2092_v4 = vpop.permute.xlu1 %2091  ;;  %2237 = vmatmul.msk.f32.vlgmr.msrb.gmra.mxu0 %vm1609_vm1, %v1996_v29  ;;  %2051 = vmatpush.msrb.mxu1 %v200_v20 }
 0x49e   :  { %v2094_v8 = vsel %vm421_vm0, %v1860_v2, %v2092_v4  ;;  %2116 = vmatpush.msrb.mxu3 %v214_v60  ;;  %vm2126_vm0 = vcmask 74752  }
 0x49f   :  { %2239 = vmatmul.msk.f32.vlgmr.msrb.gmra.mxu1 %vm1609_vm1, %v2029_v54  ;;  %2243 = vmatmul.msk.f32.vlgmr.msrb.gmra.mxu3 %vm1609_vm1, %v2094_v8 }
 0x4ea   :  { %v1691_v49 = vpop.f32.mrf.mxu2 }
 0x4ec   :  { %v1659_v17 = vpop.f32.mrf.mxu1 }
 0x4fa   :  { %v1633_v18 = vpop.f32.mrf.mxu0 }
 0x4fb   :  { %v1660_v37 = vadd.f32 %v1659_v17, %v1633_v18 }
 0x4fd   :  { %v1694_v33 = vadd.f32 %v1691_v49, %v1660_v37 }
 0x502   :  { %v1724_v32 = vpop.f32.mrf.mxu3 }
 0x503   :  { %v1727_v57 = vadd.f32 %v1724_v32, %v1694_v33 }
 0x504   :  { %v1757_v21 = vpop.f32.mrf.mxu0 }
 0x505   :  { %v1760_v7 = vadd.f32 %v1757_v21, %v1727_v57 }
 0x508   :  { %v1823_v44 = vpop.f32.mrf.mxu2 }
 0x50a   :  { %v1790_v22 = vpop.f32.mrf.mxu1  ;;  %v1855_v27 = vpop.f32.mrf.mxu3 }
 0x50b   :  { %v1793_v10 = vadd.f32 %v1790_v22, %v1760_v7 }
 0x50c   :  { %v1888_v47 = vpop.f32.mrf.mxu0 }
 0x50d   :  { %v1826_v13 = vadd.f32 %v1823_v44, %v1793_v10 }
 0x50f   :  { %v1858_v2 = vadd.f32 %v1855_v27, %v1826_v13 }
 0x511   :  { %v1891_v48 = vadd.f32 %v1888_v47, %v1858_v2 }
 0x512   :  { %v1954_v0 = vpop.f32.mrf.mxu2 }
 0x514   :  { %v1921_v39 = vpop.f32.mrf.mxu1 }
 0x515   :  { %v1924_v3 = vadd.f32 %v1921_v39, %v1891_v48 }
 0x517   :  { %v1957_v38 = vadd.f32 %v1954_v0, %v1924_v3 }
 0x518   :  { %v1987_v31 = vpop.f32.mrf.mxu3 }
 0x519   :  { %v1990_v51 = vadd.f32 %v1987_v31, %v1957_v38 }
 0x51a   :  { %v2020_v41 = vpop.f32.mrf.mxu0  ;;  %v2086_v16 = vpop.f32.mrf.mxu2 }
 0x51b   :  { %v2023_v62 = vadd.f32 %v2020_v41, %v1990_v51 }
 0x51c   :  { %v2053_v24 = vpop.f32.mrf.mxu1 }
 0x51d   :  { %v2056_v59 = vadd.f32 %v2053_v24, %v2023_v62 }
 0x51f   :  { %v2089_v45 = vadd.f32 %v2086_v16, %v2056_v59 }
 0x522   :  { %v2118_v58 = vpop.f32.mrf.mxu3 }
 0x523   :  { %v2121_v40 = vadd.f32 %v2118_v58, %v2089_v45 }
 0x525   :  { %v2125_v23 = vadd.f32 %v2479_v56, %v2121_v40 }
 0x527   :  { %v2128_v5 = vsel %vm2126_vm0, %v2125_v23, -inf  ;;  %2127 = vst.msk [vmem:[#allocation2] sm:$0x3] %vm2126_vm0, %v2125_v23 }
 0x528   :  { %2129 = vmax.xlane.f32.xlu0 %v2128_v5  ;;  %2150 = dma.vmem_to_hbm [thread:$0]  %s2146_s22, 32, %s2148_s21, [#allocation3]  }
 0x59b   :  { %v2130_v50 = vpop.xlane.xlu0 %2129 }
 0x59c   :  { %v2131_v63 = vsub.f32 %v2125_v23, %v2130_v50 }
 0x59e   :  { %v2132_v53 = vmul.f32 1.442695, %v2131_v63 }
 0x5a0   :  { %2480 = vpow2.f32 %v2132_v53 }
 0x5a6   :  { %v2481_v25 = vpop.eup %2480 }
 0x5a7   :  { %v2134_v61 = vsel %vm2126_vm0, %v2481_v25, 0.0 }
 0x5a8   :  { %2135 = vadd.xlane.f32.xlu1 %v2134_v61 }
 0x61b   :  { %v2136_v55 = vpop.xlane.xlu1 %2135 }
 0x61c   :  { %2482 = vrcp.f32 %v2136_v55 }
 0x622   :  { %v2483_v52 = vpop.eup %2482 }
 0x623   :  { %v2138_v14 = vmul.f32 %v2483_v52, %v2481_v25 }
 0x625   :  { %2139 = vst.msk [vmem:[#allocation4] sm:$0x3] %vm2126_vm0, %v2138_v14 }
 0x626   :  { %2161 = dma.vmem_to_hbm [thread:$0]  %s2157_s1, 32, %s2159_s24, [#allocation5]  }
 0x627   :  { %2532 = dma.done.wait [#allocation3], 32  }
 0x628   :  { %2533 = vsyncadd [#allocation3], 4294967264 }
 0x629   :  { %2534 = dma.done.wait [#allocation5], 32  }
 0x62a   :  { %2535 = vsyncadd [#allocation5], 4294967264 }
 0x62b   :  { %2170 = vsyncpa [#allocation3], 1 }
 0x62c   :  { %2171 = vsyncpa [#allocation5], 1 }

</bundles_post_ra>
